<compile_context>
chip_gen: v7x
topology: tpu7x:2x2x1
jax: 0.10.0
libtpu: 0.0.40
codegen_flags: <defaults>
</compile_context>

<pallas_src>
import jax
import jax.numpy as jnp
from jax.experimental import pallas as pl
from jax.experimental.pallas import tpu as pltpu


# ----------------------------- Pallas kernel -------------------------------- #

def _conv_taps(in_ref, w_ref, b, ho):
    """Banded 5x5 valid conv for one batch tile.

    in_ref: (TB, H, K)      f32 ref   image rows, (width, channel) flattened into lanes
    w_ref:  (k, K, 2*128)   bf16 ref  banded weights; columns [0:128) are the even
                                      pool-column tap, [128:256) the odd tap
    b:      (1, 128)        f32       bias tiled over pooled output columns (pad lanes 0)
    returns (TB, ho, 128)   f32       max over the two column taps, + bias
    """
    tb = in_ref.shape[0]
    kdim = in_ref.shape[2]
    k = w_ref.shape[0]
    npad = w_ref.shape[2] // 2

    acc = None
    for kh in range(k):
        # (TB, ho, K) slice -> (TB*ho, K) matmul rows; 24/8 rows per image keep the
        # merge tile-aligned for f32.  Cast to bf16 right before the MXU.
        xs = in_ref[:, kh:kh + ho, :].reshape(tb * ho, kdim).astype(jnp.bfloat16)
        d = jnp.dot(xs, w_ref[kh], preferred_element_type=jnp.float32)
        acc = d if acc is None else acc + d

    cm = jnp.maximum(acc[:, :npad], acc[:, npad:]) + b     # column-tap max (+bias)
    return cm.reshape(tb, ho, npad)


def _net_kernel(x_ref, w1_ref, b1_ref, w2_ref, b2_ref,
                fc1w_ref, fc1b_ref, fc2w_ref, fc2b_ref, o_ref, a1_ref):
    # ---- conv1 (5x5 valid) + 2x2 max-pool + ReLU -> VMEM scratch (TB, 12, 128) ----
    cm1 = _conv_taps(x_ref, w1_ref, b1_ref[...], 24)        # (TB, 24, 128)
    for p in range(12):                                     # row pooling + ReLU
        a1_ref[:, p, :] = jnp.maximum(
            jnp.maximum(cm1[:, 2 * p, :], cm1[:, 2 * p + 1, :]), 0.0)

    # ---- conv2 (conv2_drop is identity at eval) + 2x2 max-pool + ReLU ----
    cm2 = _conv_taps(a1_ref, w2_ref, b2_ref[...], 8)        # (TB, 8, 128)

    # ---- fc1 over the (h, w, c) flatten, fused with conv2's row pooling ----
    h = None
    for p in range(4):
        ap = jnp.maximum(jnp.maximum(cm2[:, 2 * p, :], cm2[:, 2 * p + 1, :]), 0.0)
        d = jnp.dot(ap.astype(jnp.bfloat16), fc1w_ref[p],
                    preferred_element_type=jnp.float32)
        h = d if h is None else h + d
    h = jnp.maximum(h + fc1b_ref[...], 0.0)                 # (TB, 128); lanes >= 50 are 0
    # TODO(synk): F.dropout after fc1 is identity in eval mode; train-mode RNG dropout
    # is not implemented.

    # ---- fc2 + log_softmax over 128 padded lanes (pad lanes carry a -1e30 bias) ----
    logits = jnp.dot(h.astype(jnp.bfloat16), fc2w_ref[...],
                     preferred_element_type=jnp.float32) + fc2b_ref[...]
    m = jnp.max(logits, axis=-1, keepdims=True)
    s = jnp.sum(jnp.exp(logits - m), axis=-1, keepdims=True)
    o_ref[...] = (logits - m - jnp.log(s)).astype(o_ref.dtype)


# ------------------------------ wrapper ------------------------------------- #

def net_forward(x_nchw, packed, *, tb=128):
    """x_nchw: (N, 1, 28, 28) f32; returns log-probs (N, 10) f32."""
    n = x_nchw.shape[0]
    if n <= tb:
        tb = n
    else:
        tb = max(8, (tb // 8) * 8)       # keep the output block 8-sublane aligned
    x = x_nchw.reshape(n, 28, 28)        # Cin=1, so NHWC slab (H, W*Cin) is free

    cp = dict(dimension_semantics=("parallel",))
    if tb > 128:                          # headroom for large batch tiles (v6e)
        cp["vmem_limit_bytes"] = 48 * 1024 * 1024

    out = pl.pallas_call(
        _net_kernel,
        out_shape=jax.ShapeDtypeStruct((n, 128), jnp.float32),
        grid=(pl.cdiv(n, tb),),
        in_specs=[
            pl.BlockSpec((tb, 28, 28), lambda i: (i, 0, 0)),     # images (batch tiled)
            pl.BlockSpec((5, 28, 256), lambda i: (0, 0, 0)),     # conv1 banded weights
            pl.BlockSpec((1, 128), lambda i: (0, 0)),            # conv1 bias (tiled+pad)
            pl.BlockSpec((5, 128, 256), lambda i: (0, 0, 0)),    # conv2 banded weights
            pl.BlockSpec((1, 128), lambda i: (0, 0)),            # conv2 bias (tiled+pad)
            pl.BlockSpec((4, 128, 128), lambda i: (0, 0, 0)),    # fc1 weights (per pooled row)
            pl.BlockSpec((1, 128), lambda i: (0, 0)),            # fc1 bias (pad 0)
            pl.BlockSpec((128, 128), lambda i: (0, 0)),          # fc2 weights
            pl.BlockSpec((1, 128), lambda i: (0, 0)),            # fc2 bias (pad -1e30)
        ],
        out_specs=pl.BlockSpec((tb, 128), lambda i: (i, 0)),
        scratch_shapes=[pltpu.VMEM((tb, 12, 128), jnp.float32)],  # conv1 activations
        compiler_params=pltpu.CompilerParams(**cp),
    )(x, packed["w1_band"], packed["b1"], packed["w2_band"], packed["b2"],
      packed["fc1_w"], packed["fc1_b"], packed["fc2_w"], packed["fc2_b"])
    return out[:, :10]


# ------------------------- one-time weight packing --------------------------- #

def _pack_conv_band(w_oihw, w_in, k_pad, n_pad=128, pool=2):
    """Pack OIHW conv weights into banded matmul form (k, k_pad, 2*n_pad).

    band[kh, w*Cin+ci, dj*n_pad + q*Cout+co] = w[co, ci, kh, w - (2q+dj)]  (else 0),
    so x_rows[r+kh, :] @ band[kh] accumulates conv output row r restricted to output
    columns 2q+dj; K rows and output columns are zero-padded to 128-lane alignment.
    """
    cout, cin, k, _ = w_oihw.shape
    wo = w_in - k + 1
    pw = wo // pool
    wc = w_in * cin
    w_t = jnp.transpose(w_oihw, (2, 3, 1, 0)).astype(jnp.float32)   # (kh, kw, ci, co)
    band = jnp.zeros((k, pool, w_in, cin, pw, cout), jnp.float32)
    for dj in range(pool):
        for q in range(pw):
            c0 = pool * q + dj
            band = band.at[:, dj, c0:c0 + k, :, q, :].set(w_t)
    band = band.reshape(k, pool, wc, pw * cout)
    band = jnp.pad(band, ((0, 0), (0, 0), (0, k_pad - wc), (0, n_pad - pw * cout)))
    return jnp.concatenate([band[:, 0], band[:, 1]], axis=-1)       # (k, k_pad, 2*n_pad)


def pack_params(params):
    """One-time repack of PyTorch-layout params into lane-padded kernel layouts."""
    w1 = _pack_conv_band(params["conv1_w"], 28, k_pad=28).astype(jnp.bfloat16)    # (5,28,256)
    w2 = _pack_conv_band(params["conv2_w"], 12, k_pad=128).astype(jnp.bfloat16)   # (5,128,256)
    b1 = jnp.pad(jnp.tile(params["conv1_b"], 12), (0, 8)).reshape(1, 128).astype(jnp.float32)
    b2 = jnp.pad(jnp.tile(params["conv2_b"], 4), (0, 48)).reshape(1, 128).astype(jnp.float32)

    # fc1 input order must match the kernel's (h, w, c) activation layout; PyTorch
    # flattens NCHW i.e. (c, h, w), so permute fc1's input axis and split it per pooled
    # row h into a (4, 128, 128) stack (lanes padded 80->128, hidden padded 50->128).
    fc1 = params["fc1_w"].reshape(50, 20, 4, 4).transpose(2, 3, 1, 0)   # (h, w, c, out)
    fc1 = jnp.pad(fc1.reshape(4, 80, 50), ((0, 0), (0, 48), (0, 78))).astype(jnp.bfloat16)
    fc1_b = jnp.pad(params["fc1_b"], (0, 78)).reshape(1, 128).astype(jnp.float32)

    fc2 = jnp.pad(params["fc2_w"].T, ((0, 78), (0, 118))).astype(jnp.bfloat16)     # (128,128)
    fc2_b = jnp.concatenate(
        [params["fc2_b"].astype(jnp.float32),
         jnp.full((118,), -1e30, jnp.float32)]).reshape(1, 128)

    return dict(w1_band=w1, b1=b1, w2_band=w2, b2=b2,
                fc1_w=fc1, fc1_b=fc1_b, fc2_w=fc2, fc2_b=fc2_b)


# ------------------------- pure-JAX reference (XLA) --------------------------- #

def _reference_forward(x_nchw, params):
    """Eval-mode reference matching the PyTorch module (dropout = identity)."""
    def conv2d(x, w, b):
        y = jax.lax.conv_general_dilated(
            x, w, window_strides=(1, 1), padding="VALID",
            dimension_numbers=("NCHW", "OIHW", "NCHW"))
        return y + b.reshape(1, -1, 1, 1)

    def maxpool2(x):
        n, c, h, w = x.shape
        return x.reshape(n, c, h // 2, 2, w // 2, 2).max(axis=(3, 5))

    a = jax.nn.relu(maxpool2(conv2d(x_nchw, params["conv1_w"], params["conv1_b"])))
    a = jax.nn.relu(maxpool2(conv2d(a, params["conv2_w"], params["conv2_b"])))
    a = a.reshape(a.shape[0], -1)
    a = jax.nn.relu(a @ params["fc1_w"].T + params["fc1_b"])
    logits = a @ params["fc2_w"].T + params["fc2_b"]
    return jax.nn.log_softmax(logits, axis=-1)


def init_params(key):
    ks = jax.random.split(key, 8)

    def u(k, shape, fan_in):
        bound = 1.0 / jnp.sqrt(jnp.float32(fan_in))
        return jax.random.uniform(k, shape, jnp.float32, -bound, bound)

    return dict(
        conv1_w=u(ks[0], (10, 1, 5, 5), 1 * 25),
        conv1_b=u(ks[1], (10,), 1 * 25),
        conv2_w=u(ks[2], (20, 10, 5, 5), 10 * 25),
        conv2_b=u(ks[3], (20,), 10 * 25),
        fc1_w=u(ks[4], (50, 320), 320),
        fc1_b=u(ks[5], (50,), 320),
        fc2_w=u(ks[6], (10, 50), 50),
        fc2_b=u(ks[7], (10,), 50),
    )


if __name__ == "__main__":
    key = jax.random.PRNGKey(0)
    kx, kp = jax.random.split(key)
    # 28x28 single-channel input is forced by fc1's in_features (20*4*4 = 320).
    x = jax.random.normal(kx, (2, 1, 28, 28), jnp.float32)
    params = init_params(kp)
    packed = pack_params(params)          # one-time repack, outside the per-call graph

    out = jax.block_until_ready(jax.jit(net_forward)(x, packed))
    assert out.shape == (2, 10) and out.dtype == jnp.float32

    ref = jax.block_until_ready(jax.jit(_reference_forward)(x, params))
    max_err = float(jnp.max(jnp.abs(out - ref)))
    assert max_err < 0.15, f"kernel deviates from reference: max|err|={max_err}"

    print("KERNEL_OK")
</pallas_src>

<mosaic_0001>
module attributes {stable_mosaic.version = 11 : i64} {
  func.func @_net_kernel(%arg0: i32, %arg1: memref<2x28x28xf32, #tpu.memory_space<vmem>>, %arg2: memref<5x28x256xbf16, #tpu.memory_space<vmem>>, %arg3: memref<1x128xf32, #tpu.memory_space<vmem>>, %arg4: memref<5x128x256xbf16, #tpu.memory_space<vmem>>, %arg5: memref<1x128xf32, #tpu.memory_space<vmem>>, %arg6: memref<4x128x128xbf16, #tpu.memory_space<vmem>>, %arg7: memref<1x128xf32, #tpu.memory_space<vmem>>, %arg8: memref<128x128xbf16, #tpu.memory_space<vmem>>, %arg9: memref<1x128xf32, #tpu.memory_space<vmem>>, %arg10: memref<2x128xf32, #tpu.memory_space<vmem>>, %arg11: memref<2x12x128xf32, #tpu.memory_space<vmem>>) attributes {dimension_semantics = [#tpu.dimension_semantics<parallel>], iteration_bounds = array<i64: 1>, scalar_prefetch = 0 : i64, scratch_operands = 1 : i64, tpu.core_type = #tpu.core_type<tc>, window_params = [{transform_indices = @transform_0, window_bounds = array<i64: 2, 28, 28>}, {pipeline_mode = #tpu.pipeline_mode<synchronous>, transform_indices = @transform_1, window_bounds = array<i64: 5, 28, 256>}, {pipeline_mode = #tpu.pipeline_mode<synchronous>, transform_indices = @transform_2, window_bounds = array<i64: 1, 128>}, {pipeline_mode = #tpu.pipeline_mode<synchronous>, transform_indices = @transform_3, window_bounds = array<i64: 5, 128, 256>}, {pipeline_mode = #tpu.pipeline_mode<synchronous>, transform_indices = @transform_4, window_bounds = array<i64: 1, 128>}, {pipeline_mode = #tpu.pipeline_mode<synchronous>, transform_indices = @transform_5, window_bounds = array<i64: 4, 128, 128>}, {pipeline_mode = #tpu.pipeline_mode<synchronous>, transform_indices = @transform_6, window_bounds = array<i64: 1, 128>}, {pipeline_mode = #tpu.pipeline_mode<synchronous>, transform_indices = @transform_7, window_bounds = array<i64: 128, 128>}, {pipeline_mode = #tpu.pipeline_mode<synchronous>, transform_indices = @transform_8, window_bounds = array<i64: 1, 128>}, {transform_indices = @transform_9, window_bounds = array<i64: 2, 128>}]} {
    %c0 = arith.constant 0 : index
    %c0_0 = arith.constant 0 : index
    %0 = vector.load %arg3[%c0, %c0_0] : memref<1x128xf32, #tpu.memory_space<vmem>>, vector<1x128xf32>
    %c0_1 = arith.constant 0 : index
    %c0_2 = arith.constant 0 : index
    %c0_3 = arith.constant 0 : index
    %1 = vector.load %arg1[%c0_1, %c0_2, %c0_3] : memref<2x28x28xf32, #tpu.memory_space<vmem>>, vector<2x24x28xf32>
    %2 = vector.shape_cast %1 : vector<2x24x28xf32> to vector<48x28xf32>
    %3 = arith.truncf %2 : vector<48x28xf32> to vector<48x28xbf16>
    %c0_4 = arith.constant 0 : index
    %c0_5 = arith.constant 0 : index
    %c0_6 = arith.constant 0 : index
    %4 = vector.load %arg2[%c0_4, %c0_5, %c0_6] : memref<5x28x256xbf16, #tpu.memory_space<vmem>>, vector<1x28x256xbf16>
    %5 = vector.shape_cast %4 : vector<1x28x256xbf16> to vector<28x256xbf16>
    %cst = arith.constant dense<0.000000e+00> : vector<48x256xf32>
    %6 = tpu.matmul %3, %5, %cst {dimension_numbers = #tpu.dot_dimension_numbers<[1], [0], [0], [1], [0, 0, 1, 1], [], []>} : vector<48x28xbf16>, vector<28x256xbf16>, vector<48x256xf32> -> vector<48x256xf32>
    %c0_7 = arith.constant 0 : index
    %c1 = arith.constant 1 : index
    %c0_8 = arith.constant 0 : index
    %7 = vector.load %arg1[%c0_7, %c1, %c0_8] : memref<2x28x28xf32, #tpu.memory_space<vmem>>, vector<2x24x28xf32>
    %8 = vector.shape_cast %7 : vector<2x24x28xf32> to vector<48x28xf32>
    %9 = arith.truncf %8 : vector<48x28xf32> to vector<48x28xbf16>
    %c1_9 = arith.constant 1 : index
    %c0_10 = arith.constant 0 : index
    %c0_11 = arith.constant 0 : index
    %10 = vector.load %arg2[%c1_9, %c0_10, %c0_11] : memref<5x28x256xbf16, #tpu.memory_space<vmem>>, vector<1x28x256xbf16>
    %11 = vector.shape_cast %10 : vector<1x28x256xbf16> to vector<28x256xbf16>
    %cst_12 = arith.constant dense<0.000000e+00> : vector<48x256xf32>
    %12 = tpu.matmul %9, %11, %cst_12 {dimension_numbers = #tpu.dot_dimension_numbers<[1], [0], [0], [1], [0, 0, 1, 1], [], []>} : vector<48x28xbf16>, vector<28x256xbf16>, vector<48x256xf32> -> vector<48x256xf32>
    %13 = arith.addf %6, %12 : vector<48x256xf32>
    %c0_13 = arith.constant 0 : index
    %c2 = arith.constant 2 : index
    %c0_14 = arith.constant 0 : index
    %14 = vector.load %arg1[%c0_13, %c2, %c0_14] : memref<2x28x28xf32, #tpu.memory_space<vmem>>, vector<2x24x28xf32>
    %15 = vector.shape_cast %14 : vector<2x24x28xf32> to vector<48x28xf32>
    %16 = arith.truncf %15 : vector<48x28xf32> to vector<48x28xbf16>
    %c2_15 = arith.constant 2 : index
    %c0_16 = arith.constant 0 : index
    %c0_17 = arith.constant 0 : index
    %17 = vector.load %arg2[%c2_15, %c0_16, %c0_17] : memref<5x28x256xbf16, #tpu.memory_space<vmem>>, vector<1x28x256xbf16>
    %18 = vector.shape_cast %17 : vector<1x28x256xbf16> to vector<28x256xbf16>
    %cst_18 = arith.constant dense<0.000000e+00> : vector<48x256xf32>
    %19 = tpu.matmul %16, %18, %cst_18 {dimension_numbers = #tpu.dot_dimension_numbers<[1], [0], [0], [1], [0, 0, 1, 1], [], []>} : vector<48x28xbf16>, vector<28x256xbf16>, vector<48x256xf32> -> vector<48x256xf32>
    %20 = arith.addf %13, %19 : vector<48x256xf32>
    %c0_19 = arith.constant 0 : index
    %c3 = arith.constant 3 : index
    %c0_20 = arith.constant 0 : index
    %21 = vector.load %arg1[%c0_19, %c3, %c0_20] : memref<2x28x28xf32, #tpu.memory_space<vmem>>, vector<2x24x28xf32>
    %22 = vector.shape_cast %21 : vector<2x24x28xf32> to vector<48x28xf32>
    %23 = arith.truncf %22 : vector<48x28xf32> to vector<48x28xbf16>
    %c3_21 = arith.constant 3 : index
    %c0_22 = arith.constant 0 : index
    %c0_23 = arith.constant 0 : index
    %24 = vector.load %arg2[%c3_21, %c0_22, %c0_23] : memref<5x28x256xbf16, #tpu.memory_space<vmem>>, vector<1x28x256xbf16>
    %25 = vector.shape_cast %24 : vector<1x28x256xbf16> to vector<28x256xbf16>
    %cst_24 = arith.constant dense<0.000000e+00> : vector<48x256xf32>
    %26 = tpu.matmul %23, %25, %cst_24 {dimension_numbers = #tpu.dot_dimension_numbers<[1], [0], [0], [1], [0, 0, 1, 1], [], []>} : vector<48x28xbf16>, vector<28x256xbf16>, vector<48x256xf32> -> vector<48x256xf32>
    %27 = arith.addf %20, %26 : vector<48x256xf32>
    %c0_25 = arith.constant 0 : index
    %c4 = arith.constant 4 : index
    %c0_26 = arith.constant 0 : index
    %28 = vector.load %arg1[%c0_25, %c4, %c0_26] : memref<2x28x28xf32, #tpu.memory_space<vmem>>, vector<2x24x28xf32>
    %29 = vector.shape_cast %28 : vector<2x24x28xf32> to vector<48x28xf32>
    %30 = arith.truncf %29 : vector<48x28xf32> to vector<48x28xbf16>
    %c4_27 = arith.constant 4 : index
    %c0_28 = arith.constant 0 : index
    %c0_29 = arith.constant 0 : index
    %31 = vector.load %arg2[%c4_27, %c0_28, %c0_29] : memref<5x28x256xbf16, #tpu.memory_space<vmem>>, vector<1x28x256xbf16>
    %32 = vector.shape_cast %31 : vector<1x28x256xbf16> to vector<28x256xbf16>
    %cst_30 = arith.constant dense<0.000000e+00> : vector<48x256xf32>
    %33 = tpu.matmul %30, %32, %cst_30 {dimension_numbers = #tpu.dot_dimension_numbers<[1], [0], [0], [1], [0, 0, 1, 1], [], []>} : vector<48x28xbf16>, vector<28x256xbf16>, vector<48x256xf32> -> vector<48x256xf32>
    %34 = arith.addf %27, %33 : vector<48x256xf32>
    %35 = vector.extract_strided_slice %34 {offsets = [0, 0], sizes = [48, 128], strides = [1, 1]} : vector<48x256xf32> to vector<48x128xf32>
    %36 = vector.extract_strided_slice %34 {offsets = [0, 128], sizes = [48, 128], strides = [1, 1]} : vector<48x256xf32> to vector<48x128xf32>
    %37 = arith.maximumf %35, %36 : vector<48x128xf32>
    %38 = vector.broadcast %0 : vector<1x128xf32> to vector<48x128xf32>
    %39 = arith.addf %37, %38 : vector<48x128xf32>
    %40 = vector.shape_cast %39 : vector<48x128xf32> to vector<2x24x128xf32>
    %41 = vector.extract_strided_slice %40 {offsets = [0, 0, 0], sizes = [2, 1, 128], strides = [1, 1, 1]} : vector<2x24x128xf32> to vector<2x1x128xf32>
    %42 = vector.shape_cast %41 : vector<2x1x128xf32> to vector<2x128xf32>
    %43 = vector.extract_strided_slice %40 {offsets = [0, 1, 0], sizes = [2, 1, 128], strides = [1, 1, 1]} : vector<2x24x128xf32> to vector<2x1x128xf32>
    %44 = vector.shape_cast %43 : vector<2x1x128xf32> to vector<2x128xf32>
    %45 = arith.maximumf %42, %44 : vector<2x128xf32>
    %cst_31 = arith.constant 0.000000e+00 : f32
    %46 = vector.broadcast %cst_31 : f32 to vector<2x128xf32>
    %47 = arith.maximumf %45, %46 : vector<2x128xf32>
    %c0_32 = arith.constant 0 : index
    %c0_33 = arith.constant 0 : index
    %c0_34 = arith.constant 0 : index
    %48 = vector.load %arg11[%c0_32, %c0_33, %c0_34] : memref<2x12x128xf32, #tpu.memory_space<vmem>>, vector<2x1x128xf32>
    %49 = vector.shape_cast %48 : vector<2x1x128xf32> to vector<2x128xf32>
    %50 = vector.shape_cast %47 : vector<2x128xf32> to vector<2x1x128xf32>
    tpu.vector_store %arg11[%c0_32, %c0_33, %c0_34], %50 {strides = array<i32>} : memref<2x12x128xf32, #tpu.memory_space<vmem>>, vector<2x1x128xf32>,
    %51 = vector.extract_strided_slice %40 {offsets = [0, 2, 0], sizes = [2, 1, 128], strides = [1, 1, 1]} : vector<2x24x128xf32> to vector<2x1x128xf32>
    %52 = vector.shape_cast %51 : vector<2x1x128xf32> to vector<2x128xf32>
    %53 = vector.extract_strided_slice %40 {offsets = [0, 3, 0], sizes = [2, 1, 128], strides = [1, 1, 1]} : vector<2x24x128xf32> to vector<2x1x128xf32>
    %54 = vector.shape_cast %53 : vector<2x1x128xf32> to vector<2x128xf32>
    %55 = arith.maximumf %52, %54 : vector<2x128xf32>
    %cst_35 = arith.constant 0.000000e+00 : f32
    %56 = vector.broadcast %cst_35 : f32 to vector<2x128xf32>
    %57 = arith.maximumf %55, %56 : vector<2x128xf32>
    %c0_36 = arith.constant 0 : index
    %c1_37 = arith.constant 1 : index
    %c0_38 = arith.constant 0 : index
    %58 = vector.load %arg11[%c0_36, %c1_37, %c0_38] : memref<2x12x128xf32, #tpu.memory_space<vmem>>, vector<2x1x128xf32>
    %59 = vector.shape_cast %58 : vector<2x1x128xf32> to vector<2x128xf32>
    %60 = vector.shape_cast %57 : vector<2x128xf32> to vector<2x1x128xf32>
    tpu.vector_store %arg11[%c0_36, %c1_37, %c0_38], %60 {strides = array<i32>} : memref<2x12x128xf32, #tpu.memory_space<vmem>>, vector<2x1x128xf32>,
    %61 = vector.extract_strided_slice %40 {offsets = [0, 4, 0], sizes = [2, 1, 128], strides = [1, 1, 1]} : vector<2x24x128xf32> to vector<2x1x128xf32>
    %62 = vector.shape_cast %61 : vector<2x1x128xf32> to vector<2x128xf32>
    %63 = vector.extract_strided_slice %40 {offsets = [0, 5, 0], sizes = [2, 1, 128], strides = [1, 1, 1]} : vector<2x24x128xf32> to vector<2x1x128xf32>
    %64 = vector.shape_cast %63 : vector<2x1x128xf32> to vector<2x128xf32>
    %65 = arith.maximumf %62, %64 : vector<2x128xf32>
    %cst_39 = arith.constant 0.000000e+00 : f32
    %66 = vector.broadcast %cst_39 : f32 to vector<2x128xf32>
    %67 = arith.maximumf %65, %66 : vector<2x128xf32>
    %c0_40 = arith.constant 0 : index
    %c2_41 = arith.constant 2 : index
    %c0_42 = arith.constant 0 : index
    %68 = vector.load %arg11[%c0_40, %c2_41, %c0_42] : memref<2x12x128xf32, #tpu.memory_space<vmem>>, vector<2x1x128xf32>
    %69 = vector.shape_cast %68 : vector<2x1x128xf32> to vector<2x128xf32>
    %70 = vector.shape_cast %67 : vector<2x128xf32> to vector<2x1x128xf32>
    tpu.vector_store %arg11[%c0_40, %c2_41, %c0_42], %70 {strides = array<i32>} : memref<2x12x128xf32, #tpu.memory_space<vmem>>, vector<2x1x128xf32>,
    %71 = vector.extract_strided_slice %40 {offsets = [0, 6, 0], sizes = [2, 1, 128], strides = [1, 1, 1]} : vector<2x24x128xf32> to vector<2x1x128xf32>
    %72 = vector.shape_cast %71 : vector<2x1x128xf32> to vector<2x128xf32>
    %73 = vector.extract_strided_slice %40 {offsets = [0, 7, 0], sizes = [2, 1, 128], strides = [1, 1, 1]} : vector<2x24x128xf32> to vector<2x1x128xf32>
    %74 = vector.shape_cast %73 : vector<2x1x128xf32> to vector<2x128xf32>
    %75 = arith.maximumf %72, %74 : vector<2x128xf32>
    %cst_43 = arith.constant 0.000000e+00 : f32
    %76 = vector.broadcast %cst_43 : f32 to vector<2x128xf32>
    %77 = arith.maximumf %75, %76 : vector<2x128xf32>
    %c0_44 = arith.constant 0 : index
    %c3_45 = arith.constant 3 : index
    %c0_46 = arith.constant 0 : index
    %78 = vector.load %arg11[%c0_44, %c3_45, %c0_46] : memref<2x12x128xf32, #tpu.memory_space<vmem>>, vector<2x1x128xf32>
    %79 = vector.shape_cast %78 : vector<2x1x128xf32> to vector<2x128xf32>
    %80 = vector.shape_cast %77 : vector<2x128xf32> to vector<2x1x128xf32>
    tpu.vector_store %arg11[%c0_44, %c3_45, %c0_46], %80 {strides = array<i32>} : memref<2x12x128xf32, #tpu.memory_space<vmem>>, vector<2x1x128xf32>,
    %81 = vector.extract_strided_slice %40 {offsets = [0, 8, 0], sizes = [2, 1, 128], strides = [1, 1, 1]} : vector<2x24x128xf32> to vector<2x1x128xf32>
    %82 = vector.shape_cast %81 : vector<2x1x128xf32> to vector<2x128xf32>
    %83 = vector.extract_strided_slice %40 {offsets = [0, 9, 0], sizes = [2, 1, 128], strides = [1, 1, 1]} : vector<2x24x128xf32> to vector<2x1x128xf32>
    %84 = vector.shape_cast %83 : vector<2x1x128xf32> to vector<2x128xf32>
    %85 = arith.maximumf %82, %84 : vector<2x128xf32>
    %cst_47 = arith.constant 0.000000e+00 : f32
    %86 = vector.broadcast %cst_47 : f32 to vector<2x128xf32>
    %87 = arith.maximumf %85, %86 : vector<2x128xf32>
    %c0_48 = arith.constant 0 : index
    %c4_49 = arith.constant 4 : index
    %c0_50 = arith.constant 0 : index
    %88 = vector.load %arg11[%c0_48, %c4_49, %c0_50] : memref<2x12x128xf32, #tpu.memory_space<vmem>>, vector<2x1x128xf32>
    %89 = vector.shape_cast %88 : vector<2x1x128xf32> to vector<2x128xf32>
    %90 = vector.shape_cast %87 : vector<2x128xf32> to vector<2x1x128xf32>
    tpu.vector_store %arg11[%c0_48, %c4_49, %c0_50], %90 {strides = array<i32>} : memref<2x12x128xf32, #tpu.memory_space<vmem>>, vector<2x1x128xf32>,
    %91 = vector.extract_strided_slice %40 {offsets = [0, 10, 0], sizes = [2, 1, 128], strides = [1, 1, 1]} : vector<2x24x128xf32> to vector<2x1x128xf32>
    %92 = vector.shape_cast %91 : vector<2x1x128xf32> to vector<2x128xf32>
    %93 = vector.extract_strided_slice %40 {offsets = [0, 11, 0], sizes = [2, 1, 128], strides = [1, 1, 1]} : vector<2x24x128xf32> to vector<2x1x128xf32>
    %94 = vector.shape_cast %93 : vector<2x1x128xf32> to vector<2x128xf32>
    %95 = arith.maximumf %92, %94 : vector<2x128xf32>
    %cst_51 = arith.constant 0.000000e+00 : f32
    %96 = vector.broadcast %cst_51 : f32 to vector<2x128xf32>
    %97 = arith.maximumf %95, %96 : vector<2x128xf32>
    %c0_52 = arith.constant 0 : index
    %c5 = arith.constant 5 : index
    %c0_53 = arith.constant 0 : index
    %98 = vector.load %arg11[%c0_52, %c5, %c0_53] : memref<2x12x128xf32, #tpu.memory_space<vmem>>, vector<2x1x128xf32>
    %99 = vector.shape_cast %98 : vector<2x1x128xf32> to vector<2x128xf32>
    %100 = vector.shape_cast %97 : vector<2x128xf32> to vector<2x1x128xf32>
    tpu.vector_store %arg11[%c0_52, %c5, %c0_53], %100 {strides = array<i32>} : memref<2x12x128xf32, #tpu.memory_space<vmem>>, vector<2x1x128xf32>,
    %101 = vector.extract_strided_slice %40 {offsets = [0, 12, 0], sizes = [2, 1, 128], strides = [1, 1, 1]} : vector<2x24x128xf32> to vector<2x1x128xf32>
    %102 = vector.shape_cast %101 : vector<2x1x128xf32> to vector<2x128xf32>
    %103 = vector.extract_strided_slice %40 {offsets = [0, 13, 0], sizes = [2, 1, 128], strides = [1, 1, 1]} : vector<2x24x128xf32> to vector<2x1x128xf32>
    %104 = vector.shape_cast %103 : vector<2x1x128xf32> to vector<2x128xf32>
    %105 = arith.maximumf %102, %104 : vector<2x128xf32>
    %cst_54 = arith.constant 0.000000e+00 : f32
    %106 = vector.broadcast %cst_54 : f32 to vector<2x128xf32>
    %107 = arith.maximumf %105, %106 : vector<2x128xf32>
    %c0_55 = arith.constant 0 : index
    %c6 = arith.constant 6 : index
    %c0_56 = arith.constant 0 : index
    %108 = vector.load %arg11[%c0_55, %c6, %c0_56] : memref<2x12x128xf32, #tpu.memory_space<vmem>>, vector<2x1x128xf32>
    %109 = vector.shape_cast %108 : vector<2x1x128xf32> to vector<2x128xf32>
    %110 = vector.shape_cast %107 : vector<2x128xf32> to vector<2x1x128xf32>
    tpu.vector_store %arg11[%c0_55, %c6, %c0_56], %110 {strides = array<i32>} : memref<2x12x128xf32, #tpu.memory_space<vmem>>, vector<2x1x128xf32>,
    %111 = vector.extract_strided_slice %40 {offsets = [0, 14, 0], sizes = [2, 1, 128], strides = [1, 1, 1]} : vector<2x24x128xf32> to vector<2x1x128xf32>
    %112 = vector.shape_cast %111 : vector<2x1x128xf32> to vector<2x128xf32>
    %113 = vector.extract_strided_slice %40 {offsets = [0, 15, 0], sizes = [2, 1, 128], strides = [1, 1, 1]} : vector<2x24x128xf32> to vector<2x1x128xf32>
    %114 = vector.shape_cast %113 : vector<2x1x128xf32> to vector<2x128xf32>
    %115 = arith.maximumf %112, %114 : vector<2x128xf32>
    %cst_57 = arith.constant 0.000000e+00 : f32
    %116 = vector.broadcast %cst_57 : f32 to vector<2x128xf32>
    %117 = arith.maximumf %115, %116 : vector<2x128xf32>
    %c0_58 = arith.constant 0 : index
    %c7 = arith.constant 7 : index
    %c0_59 = arith.constant 0 : index
    %118 = vector.load %arg11[%c0_58, %c7, %c0_59] : memref<2x12x128xf32, #tpu.memory_space<vmem>>, vector<2x1x128xf32>
    %119 = vector.shape_cast %118 : vector<2x1x128xf32> to vector<2x128xf32>
    %120 = vector.shape_cast %117 : vector<2x128xf32> to vector<2x1x128xf32>
    tpu.vector_store %arg11[%c0_58, %c7, %c0_59], %120 {strides = array<i32>} : memref<2x12x128xf32, #tpu.memory_space<vmem>>, vector<2x1x128xf32>,
    %121 = vector.extract_strided_slice %40 {offsets = [0, 16, 0], sizes = [2, 1, 128], strides = [1, 1, 1]} : vector<2x24x128xf32> to vector<2x1x128xf32>
    %122 = vector.shape_cast %121 : vector<2x1x128xf32> to vector<2x128xf32>
    %123 = vector.extract_strided_slice %40 {offsets = [0, 17, 0], sizes = [2, 1, 128], strides = [1, 1, 1]} : vector<2x24x128xf32> to vector<2x1x128xf32>
    %124 = vector.shape_cast %123 : vector<2x1x128xf32> to vector<2x128xf32>
    %125 = arith.maximumf %122, %124 : vector<2x128xf32>
    %cst_60 = arith.constant 0.000000e+00 : f32
    %126 = vector.broadcast %cst_60 : f32 to vector<2x128xf32>
    %127 = arith.maximumf %125, %126 : vector<2x128xf32>
    %c0_61 = arith.constant 0 : index
    %c8 = arith.constant 8 : index
    %c0_62 = arith.constant 0 : index
    %128 = vector.load %arg11[%c0_61, %c8, %c0_62] : memref<2x12x128xf32, #tpu.memory_space<vmem>>, vector<2x1x128xf32>
    %129 = vector.shape_cast %128 : vector<2x1x128xf32> to vector<2x128xf32>
    %130 = vector.shape_cast %127 : vector<2x128xf32> to vector<2x1x128xf32>
    tpu.vector_store %arg11[%c0_61, %c8, %c0_62], %130 {strides = array<i32>} : memref<2x12x128xf32, #tpu.memory_space<vmem>>, vector<2x1x128xf32>,
    %131 = vector.extract_strided_slice %40 {offsets = [0, 18, 0], sizes = [2, 1, 128], strides = [1, 1, 1]} : vector<2x24x128xf32> to vector<2x1x128xf32>
    %132 = vector.shape_cast %131 : vector<2x1x128xf32> to vector<2x128xf32>
    %133 = vector.extract_strided_slice %40 {offsets = [0, 19, 0], sizes = [2, 1, 128], strides = [1, 1, 1]} : vector<2x24x128xf32> to vector<2x1x128xf32>
    %134 = vector.shape_cast %133 : vector<2x1x128xf32> to vector<2x128xf32>
    %135 = arith.maximumf %132, %134 : vector<2x128xf32>
    %cst_63 = arith.constant 0.000000e+00 : f32
    %136 = vector.broadcast %cst_63 : f32 to vector<2x128xf32>
    %137 = arith.maximumf %135, %136 : vector<2x128xf32>
    %c0_64 = arith.constant 0 : index
    %c9 = arith.constant 9 : index
    %c0_65 = arith.constant 0 : index
    %138 = vector.load %arg11[%c0_64, %c9, %c0_65] : memref<2x12x128xf32, #tpu.memory_space<vmem>>, vector<2x1x128xf32>
    %139 = vector.shape_cast %138 : vector<2x1x128xf32> to vector<2x128xf32>
    %140 = vector.shape_cast %137 : vector<2x128xf32> to vector<2x1x128xf32>
    tpu.vector_store %arg11[%c0_64, %c9, %c0_65], %140 {strides = array<i32>} : memref<2x12x128xf32, #tpu.memory_space<vmem>>, vector<2x1x128xf32>,
    %141 = vector.extract_strided_slice %40 {offsets = [0, 20, 0], sizes = [2, 1, 128], strides = [1, 1, 1]} : vector<2x24x128xf32> to vector<2x1x128xf32>
    %142 = vector.shape_cast %141 : vector<2x1x128xf32> to vector<2x128xf32>
    %143 = vector.extract_strided_slice %40 {offsets = [0, 21, 0], sizes = [2, 1, 128], strides = [1, 1, 1]} : vector<2x24x128xf32> to vector<2x1x128xf32>
    %144 = vector.shape_cast %143 : vector<2x1x128xf32> to vector<2x128xf32>
    %145 = arith.maximumf %142, %144 : vector<2x128xf32>
    %cst_66 = arith.constant 0.000000e+00 : f32
    %146 = vector.broadcast %cst_66 : f32 to vector<2x128xf32>
    %147 = arith.maximumf %145, %146 : vector<2x128xf32>
    %c0_67 = arith.constant 0 : index
    %c10 = arith.constant 10 : index
    %c0_68 = arith.constant 0 : index
    %148 = vector.load %arg11[%c0_67, %c10, %c0_68] : memref<2x12x128xf32, #tpu.memory_space<vmem>>, vector<2x1x128xf32>
    %149 = vector.shape_cast %148 : vector<2x1x128xf32> to vector<2x128xf32>
    %150 = vector.shape_cast %147 : vector<2x128xf32> to vector<2x1x128xf32>
    tpu.vector_store %arg11[%c0_67, %c10, %c0_68], %150 {strides = array<i32>} : memref<2x12x128xf32, #tpu.memory_space<vmem>>, vector<2x1x128xf32>,
    %151 = vector.extract_strided_slice %40 {offsets = [0, 22, 0], sizes = [2, 1, 128], strides = [1, 1, 1]} : vector<2x24x128xf32> to vector<2x1x128xf32>
    %152 = vector.shape_cast %151 : vector<2x1x128xf32> to vector<2x128xf32>
    %153 = vector.extract_strided_slice %40 {offsets = [0, 23, 0], sizes = [2, 1, 128], strides = [1, 1, 1]} : vector<2x24x128xf32> to vector<2x1x128xf32>
    %154 = vector.shape_cast %153 : vector<2x1x128xf32> to vector<2x128xf32>
    %155 = arith.maximumf %152, %154 : vector<2x128xf32>
    %cst_69 = arith.constant 0.000000e+00 : f32
    %156 = vector.broadcast %cst_69 : f32 to vector<2x128xf32>
    %157 = arith.maximumf %155, %156 : vector<2x128xf32>
    %c0_70 = arith.constant 0 : index
    %c11 = arith.constant 11 : index
    %c0_71 = arith.constant 0 : index
    %158 = vector.load %arg11[%c0_70, %c11, %c0_71] : memref<2x12x128xf32, #tpu.memory_space<vmem>>, vector<2x1x128xf32>
    %159 = vector.shape_cast %158 : vector<2x1x128xf32> to vector<2x128xf32>
    %160 = vector.shape_cast %157 : vector<2x128xf32> to vector<2x1x128xf32>
    tpu.vector_store %arg11[%c0_70, %c11, %c0_71], %160 {strides = array<i32>} : memref<2x12x128xf32, #tpu.memory_space<vmem>>, vector<2x1x128xf32>,
    %c0_72 = arith.constant 0 : index
    %c0_73 = arith.constant 0 : index
    %161 = vector.load %arg5[%c0_72, %c0_73] : memref<1x128xf32, #tpu.memory_space<vmem>>, vector<1x128xf32>
    %c0_74 = arith.constant 0 : index
    %c0_75 = arith.constant 0 : index
    %c0_76 = arith.constant 0 : index
    %162 = vector.load %arg11[%c0_74, %c0_75, %c0_76] : memref<2x12x128xf32, #tpu.memory_space<vmem>>, vector<2x8x128xf32>
    %163 = vector.shape_cast %162 : vector<2x8x128xf32> to vector<16x128xf32>
    %164 = arith.truncf %163 : vector<16x128xf32> to vector<16x128xbf16>
    %c0_77 = arith.constant 0 : index
    %c0_78 = arith.constant 0 : index
    %c0_79 = arith.constant 0 : index
    %165 = vector.load %arg4[%c0_77, %c0_78, %c0_79] : memref<5x128x256xbf16, #tpu.memory_space<vmem>>, vector<1x128x256xbf16>
    %166 = vector.shape_cast %165 : vector<1x128x256xbf16> to vector<128x256xbf16>
    %cst_80 = arith.constant dense<0.000000e+00> : vector<16x256xf32>
    %167 = tpu.matmul %164, %166, %cst_80 {dimension_numbers = #tpu.dot_dimension_numbers<[1], [0], [0], [1], [0, 0, 1, 1], [], []>} : vector<16x128xbf16>, vector<128x256xbf16>, vector<16x256xf32> -> vector<16x256xf32>
    %c0_81 = arith.constant 0 : index
    %c1_82 = arith.constant 1 : index
    %c0_83 = arith.constant 0 : index
    %168 = vector.load %arg11[%c0_81, %c1_82, %c0_83] : memref<2x12x128xf32, #tpu.memory_space<vmem>>, vector<2x8x128xf32>
    %169 = vector.shape_cast %168 : vector<2x8x128xf32> to vector<16x128xf32>
    %170 = arith.truncf %169 : vector<16x128xf32> to vector<16x128xbf16>
    %c1_84 = arith.constant 1 : index
    %c0_85 = arith.constant 0 : index
    %c0_86 = arith.constant 0 : index
    %171 = vector.load %arg4[%c1_84, %c0_85, %c0_86] : memref<5x128x256xbf16, #tpu.memory_space<vmem>>, vector<1x128x256xbf16>
    %172 = vector.shape_cast %171 : vector<1x128x256xbf16> to vector<128x256xbf16>
    %cst_87 = arith.constant dense<0.000000e+00> : vector<16x256xf32>
    %173 = tpu.matmul %170, %172, %cst_87 {dimension_numbers = #tpu.dot_dimension_numbers<[1], [0], [0], [1], [0, 0, 1, 1], [], []>} : vector<16x128xbf16>, vector<128x256xbf16>, vector<16x256xf32> -> vector<16x256xf32>
    %174 = arith.addf %167, %173 : vector<16x256xf32>
    %c0_88 = arith.constant 0 : index
    %c2_89 = arith.constant 2 : index
    %c0_90 = arith.constant 0 : index
    %175 = vector.load %arg11[%c0_88, %c2_89, %c0_90] : memref<2x12x128xf32, #tpu.memory_space<vmem>>, vector<2x8x128xf32>
    %176 = vector.shape_cast %175 : vector<2x8x128xf32> to vector<16x128xf32>
    %177 = arith.truncf %176 : vector<16x128xf32> to vector<16x128xbf16>
    %c2_91 = arith.constant 2 : index
    %c0_92 = arith.constant 0 : index
    %c0_93 = arith.constant 0 : index
    %178 = vector.load %arg4[%c2_91, %c0_92, %c0_93] : memref<5x128x256xbf16, #tpu.memory_space<vmem>>, vector<1x128x256xbf16>
    %179 = vector.shape_cast %178 : vector<1x128x256xbf16> to vector<128x256xbf16>
    %cst_94 = arith.constant dense<0.000000e+00> : vector<16x256xf32>
    %180 = tpu.matmul %177, %179, %cst_94 {dimension_numbers = #tpu.dot_dimension_numbers<[1], [0], [0], [1], [0, 0, 1, 1], [], []>} : vector<16x128xbf16>, vector<128x256xbf16>, vector<16x256xf32> -> vector<16x256xf32>
    %181 = arith.addf %174, %180 : vector<16x256xf32>
    %c0_95 = arith.constant 0 : index
    %c3_96 = arith.constant 3 : index
    %c0_97 = arith.constant 0 : index
    %182 = vector.load %arg11[%c0_95, %c3_96, %c0_97] : memref<2x12x128xf32, #tpu.memory_space<vmem>>, vector<2x8x128xf32>
    %183 = vector.shape_cast %182 : vector<2x8x128xf32> to vector<16x128xf32>
    %184 = arith.truncf %183 : vector<16x128xf32> to vector<16x128xbf16>
    %c3_98 = arith.constant 3 : index
    %c0_99 = arith.constant 0 : index
    %c0_100 = arith.constant 0 : index
    %185 = vector.load %arg4[%c3_98, %c0_99, %c0_100] : memref<5x128x256xbf16, #tpu.memory_space<vmem>>, vector<1x128x256xbf16>
    %186 = vector.shape_cast %185 : vector<1x128x256xbf16> to vector<128x256xbf16>
    %cst_101 = arith.constant dense<0.000000e+00> : vector<16x256xf32>
    %187 = tpu.matmul %184, %186, %cst_101 {dimension_numbers = #tpu.dot_dimension_numbers<[1], [0], [0], [1], [0, 0, 1, 1], [], []>} : vector<16x128xbf16>, vector<128x256xbf16>, vector<16x256xf32> -> vector<16x256xf32>
    %188 = arith.addf %181, %187 : vector<16x256xf32>
    %c0_102 = arith.constant 0 : index
    %c4_103 = arith.constant 4 : index
    %c0_104 = arith.constant 0 : index
    %189 = vector.load %arg11[%c0_102, %c4_103, %c0_104] : memref<2x12x128xf32, #tpu.memory_space<vmem>>, vector<2x8x128xf32>
    %190 = vector.shape_cast %189 : vector<2x8x128xf32> to vector<16x128xf32>
    %191 = arith.truncf %190 : vector<16x128xf32> to vector<16x128xbf16>
    %c4_105 = arith.constant 4 : index
    %c0_106 = arith.constant 0 : index
    %c0_107 = arith.constant 0 : index
    %192 = vector.load %arg4[%c4_105, %c0_106, %c0_107] : memref<5x128x256xbf16, #tpu.memory_space<vmem>>, vector<1x128x256xbf16>
    %193 = vector.shape_cast %192 : vector<1x128x256xbf16> to vector<128x256xbf16>
    %cst_108 = arith.constant dense<0.000000e+00> : vector<16x256xf32>
    %194 = tpu.matmul %191, %193, %cst_108 {dimension_numbers = #tpu.dot_dimension_numbers<[1], [0], [0], [1], [0, 0, 1, 1], [], []>} : vector<16x128xbf16>, vector<128x256xbf16>, vector<16x256xf32> -> vector<16x256xf32>
    %195 = arith.addf %188, %194 : vector<16x256xf32>
    %196 = vector.extract_strided_slice %195 {offsets = [0, 0], sizes = [16, 128], strides = [1, 1]} : vector<16x256xf32> to vector<16x128xf32>
    %197 = vector.extract_strided_slice %195 {offsets = [0, 128], sizes = [16, 128], strides = [1, 1]} : vector<16x256xf32> to vector<16x128xf32>
    %198 = arith.maximumf %196, %197 : vector<16x128xf32>
    %199 = vector.broadcast %161 : vector<1x128xf32> to vector<16x128xf32>
    %200 = arith.addf %198, %199 : vector<16x128xf32>
    %201 = vector.shape_cast %200 : vector<16x128xf32> to vector<2x8x128xf32>
    %202 = vector.extract_strided_slice %201 {offsets = [0, 0, 0], sizes = [2, 1, 128], strides = [1, 1, 1]} : vector<2x8x128xf32> to vector<2x1x128xf32>
    %203 = vector.shape_cast %202 : vector<2x1x128xf32> to vector<2x128xf32>
    %204 = vector.extract_strided_slice %201 {offsets = [0, 1, 0], sizes = [2, 1, 128], strides = [1, 1, 1]} : vector<2x8x128xf32> to vector<2x1x128xf32>
    %205 = vector.shape_cast %204 : vector<2x1x128xf32> to vector<2x128xf32>
    %206 = arith.maximumf %203, %205 : vector<2x128xf32>
    %cst_109 = arith.constant 0.000000e+00 : f32
    %207 = vector.broadcast %cst_109 : f32 to vector<2x128xf32>
    %208 = arith.maximumf %206, %207 : vector<2x128xf32>
    %209 = arith.truncf %208 : vector<2x128xf32> to vector<2x128xbf16>
    %c0_110 = arith.constant 0 : index
    %c0_111 = arith.constant 0 : index
    %c0_112 = arith.constant 0 : index
    %210 = vector.load %arg6[%c0_110, %c0_111, %c0_112] : memref<4x128x128xbf16, #tpu.memory_space<vmem>>, vector<1x128x128xbf16>
    %211 = vector.shape_cast %210 : vector<1x128x128xbf16> to vector<128x128xbf16>
    %cst_113 = arith.constant dense<0.000000e+00> : vector<2x128xf32>
    %212 = tpu.matmul %209, %211, %cst_113 {dimension_numbers = #tpu.dot_dimension_numbers<[1], [0], [0], [1], [0, 0, 1, 1], [], []>} : vector<2x128xbf16>, vector<128x128xbf16>, vector<2x128xf32> -> vector<2x128xf32>
    %213 = vector.extract_strided_slice %201 {offsets = [0, 2, 0], sizes = [2, 1, 128], strides = [1, 1, 1]} : vector<2x8x128xf32> to vector<2x1x128xf32>
    %214 = vector.shape_cast %213 : vector<2x1x128xf32> to vector<2x128xf32>
    %215 = vector.extract_strided_slice %201 {offsets = [0, 3, 0], sizes = [2, 1, 128], strides = [1, 1, 1]} : vector<2x8x128xf32> to vector<2x1x128xf32>
    %216 = vector.shape_cast %215 : vector<2x1x128xf32> to vector<2x128xf32>
    %217 = arith.maximumf %214, %216 : vector<2x128xf32>
    %cst_114 = arith.constant 0.000000e+00 : f32
    %218 = vector.broadcast %cst_114 : f32 to vector<2x128xf32>
    %219 = arith.maximumf %217, %218 : vector<2x128xf32>
    %220 = arith.truncf %219 : vector<2x128xf32> to vector<2x128xbf16>
    %c1_115 = arith.constant 1 : index
    %c0_116 = arith.constant 0 : index
    %c0_117 = arith.constant 0 : index
    %221 = vector.load %arg6[%c1_115, %c0_116, %c0_117] : memref<4x128x128xbf16, #tpu.memory_space<vmem>>, vector<1x128x128xbf16>
    %222 = vector.shape_cast %221 : vector<1x128x128xbf16> to vector<128x128xbf16>
    %cst_118 = arith.constant dense<0.000000e+00> : vector<2x128xf32>
    %223 = tpu.matmul %220, %222, %cst_118 {dimension_numbers = #tpu.dot_dimension_numbers<[1], [0], [0], [1], [0, 0, 1, 1], [], []>} : vector<2x128xbf16>, vector<128x128xbf16>, vector<2x128xf32> -> vector<2x128xf32>
    %224 = arith.addf %212, %223 : vector<2x128xf32>
    %225 = vector.extract_strided_slice %201 {offsets = [0, 4, 0], sizes = [2, 1, 128], strides = [1, 1, 1]} : vector<2x8x128xf32> to vector<2x1x128xf32>
    %226 = vector.shape_cast %225 : vector<2x1x128xf32> to vector<2x128xf32>
    %227 = vector.extract_strided_slice %201 {offsets = [0, 5, 0], sizes = [2, 1, 128], strides = [1, 1, 1]} : vector<2x8x128xf32> to vector<2x1x128xf32>
    %228 = vector.shape_cast %227 : vector<2x1x128xf32> to vector<2x128xf32>
    %229 = arith.maximumf %226, %228 : vector<2x128xf32>
    %cst_119 = arith.constant 0.000000e+00 : f32
    %230 = vector.broadcast %cst_119 : f32 to vector<2x128xf32>
    %231 = arith.maximumf %229, %230 : vector<2x128xf32>
    %232 = arith.truncf %231 : vector<2x128xf32> to vector<2x128xbf16>
    %c2_120 = arith.constant 2 : index
    %c0_121 = arith.constant 0 : index
    %c0_122 = arith.constant 0 : index
    %233 = vector.load %arg6[%c2_120, %c0_121, %c0_122] : memref<4x128x128xbf16, #tpu.memory_space<vmem>>, vector<1x128x128xbf16>
    %234 = vector.shape_cast %233 : vector<1x128x128xbf16> to vector<128x128xbf16>
    %cst_123 = arith.constant dense<0.000000e+00> : vector<2x128xf32>
    %235 = tpu.matmul %232, %234, %cst_123 {dimension_numbers = #tpu.dot_dimension_numbers<[1], [0], [0], [1], [0, 0, 1, 1], [], []>} : vector<2x128xbf16>, vector<128x128xbf16>, vector<2x128xf32> -> vector<2x128xf32>
    %236 = arith.addf %224, %235 : vector<2x128xf32>
    %237 = vector.extract_strided_slice %201 {offsets = [0, 6, 0], sizes = [2, 1, 128], strides = [1, 1, 1]} : vector<2x8x128xf32> to vector<2x1x128xf32>
    %238 = vector.shape_cast %237 : vector<2x1x128xf32> to vector<2x128xf32>
    %239 = vector.extract_strided_slice %201 {offsets = [0, 7, 0], sizes = [2, 1, 128], strides = [1, 1, 1]} : vector<2x8x128xf32> to vector<2x1x128xf32>
    %240 = vector.shape_cast %239 : vector<2x1x128xf32> to vector<2x128xf32>
    %241 = arith.maximumf %238, %240 : vector<2x128xf32>
    %cst_124 = arith.constant 0.000000e+00 : f32
    %242 = vector.broadcast %cst_124 : f32 to vector<2x128xf32>
    %243 = arith.maximumf %241, %242 : vector<2x128xf32>
    %244 = arith.truncf %243 : vector<2x128xf32> to vector<2x128xbf16>
    %c3_125 = arith.constant 3 : index
    %c0_126 = arith.constant 0 : index
    %c0_127 = arith.constant 0 : index
    %245 = vector.load %arg6[%c3_125, %c0_126, %c0_127] : memref<4x128x128xbf16, #tpu.memory_space<vmem>>, vector<1x128x128xbf16>
    %246 = vector.shape_cast %245 : vector<1x128x128xbf16> to vector<128x128xbf16>
    %cst_128 = arith.constant dense<0.000000e+00> : vector<2x128xf32>
    %247 = tpu.matmul %244, %246, %cst_128 {dimension_numbers = #tpu.dot_dimension_numbers<[1], [0], [0], [1], [0, 0, 1, 1], [], []>} : vector<2x128xbf16>, vector<128x128xbf16>, vector<2x128xf32> -> vector<2x128xf32>
    %248 = arith.addf %236, %247 : vector<2x128xf32>
    %c0_129 = arith.constant 0 : index
    %c0_130 = arith.constant 0 : index
    %249 = vector.load %arg7[%c0_129, %c0_130] : memref<1x128xf32, #tpu.memory_space<vmem>>, vector<1x128xf32>
    %250 = vector.broadcast %249 : vector<1x128xf32> to vector<2x128xf32>
    %251 = arith.addf %248, %250 : vector<2x128xf32>
    %cst_131 = arith.constant 0.000000e+00 : f32
    %252 = vector.broadcast %cst_131 : f32 to vector<2x128xf32>
    %253 = arith.maximumf %251, %252 : vector<2x128xf32>
    %254 = arith.truncf %253 : vector<2x128xf32> to vector<2x128xbf16>
    %c0_132 = arith.constant 0 : index
    %c0_133 = arith.constant 0 : index
    %255 = vector.load %arg8[%c0_132, %c0_133] : memref<128x128xbf16, #tpu.memory_space<vmem>>, vector<128x128xbf16>
    %cst_134 = arith.constant dense<0.000000e+00> : vector<2x128xf32>
    %256 = tpu.matmul %254, %255, %cst_134 {dimension_numbers = #tpu.dot_dimension_numbers<[1], [0], [0], [1], [0, 0, 1, 1], [], []>} : vector<2x128xbf16>, vector<128x128xbf16>, vector<2x128xf32> -> vector<2x128xf32>
    %c0_135 = arith.constant 0 : index
    %c0_136 = arith.constant 0 : index
    %257 = vector.load %arg9[%c0_135, %c0_136] : memref<1x128xf32, #tpu.memory_space<vmem>>, vector<1x128xf32>
    %258 = vector.broadcast %257 : vector<1x128xf32> to vector<2x128xf32>
    %259 = arith.addf %256, %258 : vector<2x128xf32>
    %cst_137 = arith.constant dense<0xFF800000> : vector<2xf32>
    %260 = vector.multi_reduction <maximumf>, %259, %cst_137 [1] : vector<2x128xf32> to vector<2xf32>
    %261 = vector.shape_cast %260 : vector<2xf32> to vector<2x1xf32>
    %262 = vector.broadcast %261 : vector<2x1xf32> to vector<2x128xf32>
    %263 = arith.subf %259, %262 : vector<2x128xf32>
    %264 = math.exp %263 : vector<2x128xf32>
    %cst_138 = arith.constant dense<0.000000e+00> : vector<2xf32>
    %265 = vector.multi_reduction <add>, %264, %cst_138 [1] : vector<2x128xf32> to vector<2xf32>
    %266 = vector.shape_cast %265 : vector<2xf32> to vector<2x1xf32>
    %267 = vector.broadcast %261 : vector<2x1xf32> to vector<2x128xf32>
    %268 = arith.subf %259, %267 : vector<2x128xf32>
    %269 = math.log %266 : vector<2x1xf32>
    %270 = vector.broadcast %269 : vector<2x1xf32> to vector<2x128xf32>
    %271 = arith.subf %268, %270 : vector<2x128xf32>
    %c0_139 = arith.constant 0 : index
    %c0_140 = arith.constant 0 : index
    %272 = vector.load %arg10[%c0_139, %c0_140] : memref<2x128xf32, #tpu.memory_space<vmem>>, vector<2x128xf32>
    tpu.vector_store %arg10[%c0_139, %c0_140], %271 {strides = array<i32>} : memref<2x128xf32, #tpu.memory_space<vmem>>, vector<2x128xf32>,
    return
  }
  func.func @transform_0(%arg0: i32) -> (i32, i32, i32) {
    %c0_i32 = arith.constant 0 : i32
    %c0_i32_0 = arith.constant 0 : i32
    %c0_i32_1 = arith.constant 0 : i32
    return %arg0, %c0_i32, %c0_i32_0 : i32, i32, i32
  }
  func.func @transform_1(%arg0: i32) -> (i32, i32, i32) {
    %c0_i32 = arith.constant 0 : i32
    %c0_i32_0 = arith.constant 0 : i32
    %c0_i32_1 = arith.constant 0 : i32
    %c0_i32_2 = arith.constant 0 : i32
    return %c0_i32, %c0_i32_0, %c0_i32_1 : i32, i32, i32
  }
  func.func @transform_2(%arg0: i32) -> (i32, i32) {
    %c0_i32 = arith.constant 0 : i32
    %c0_i32_0 = arith.constant 0 : i32
    %c0_i32_1 = arith.constant 0 : i32
    return %c0_i32, %c0_i32_0 : i32, i32
  }
  func.func @transform_3(%arg0: i32) -> (i32, i32, i32) {
    %c0_i32 = arith.constant 0 : i32
    %c0_i32_0 = arith.constant 0 : i32
    %c0_i32_1 = arith.constant 0 : i32
    %c0_i32_2 = arith.constant 0 : i32
    return %c0_i32, %c0_i32_0, %c0_i32_1 : i32, i32, i32
  }
  func.func @transform_4(%arg0: i32) -> (i32, i32) {
    %c0_i32 = arith.constant 0 : i32
    %c0_i32_0 = arith.constant 0 : i32
    %c0_i32_1 = arith.constant 0 : i32
    return %c0_i32, %c0_i32_0 : i32, i32
  }
  func.func @transform_5(%arg0: i32) -> (i32, i32, i32) {
    %c0_i32 = arith.constant 0 : i32
    %c0_i32_0 = arith.constant 0 : i32
    %c0_i32_1 = arith.constant 0 : i32
    %c0_i32_2 = arith.constant 0 : i32
    return %c0_i32, %c0_i32_0, %c0_i32_1 : i32, i32, i32
  }
  func.func @transform_6(%arg0: i32) -> (i32, i32) {
    %c0_i32 = arith.constant 0 : i32
    %c0_i32_0 = arith.constant 0 : i32
    %c0_i32_1 = arith.constant 0 : i32
    return %c0_i32, %c0_i32_0 : i32, i32
  }
  func.func @transform_7(%arg0: i32) -> (i32, i32) {
    %c0_i32 = arith.constant 0 : i32
    %c0_i32_0 = arith.constant 0 : i32
    %c0_i32_1 = arith.constant 0 : i32
    return %c0_i32, %c0_i32_0 : i32, i32
  }
  func.func @transform_8(%arg0: i32) -> (i32, i32) {
    %c0_i32 = arith.constant 0 : i32
    %c0_i32_0 = arith.constant 0 : i32
    %c0_i32_1 = arith.constant 0 : i32
    return %c0_i32, %c0_i32_0 : i32, i32
  }
  func.func @transform_9(%arg0: i32) -> (i32, i32) {
    %c0_i32 = arith.constant 0 : i32
    %c0_i32_0 = arith.constant 0 : i32
    return %arg0, %c0_i32 : i32, i32
  }
}

</mosaic_0001>

<bundles_post_ra>
// kernel: net_forward.1
= control target key start
LH: loop header
LB: loop body
LE: loop exit
PB: predicated region body
PF: predicated region fallthrough
CT: control target
= control target key end

     0   :  { %14 = vsyncpa [#allocation4], 0  ;;  %s3109_s0 = inlined_call_operand.vmem [shape: f32[2,28,28], index: 0, kind: input, shape index: {}]   ;;  %s3110_s1 = inlined_call_operand.vmem [shape: bf16[5,28,256], index: 1, kind: input, shape index: {}]   ;;  %s3111_s2 = inlined_call_operand.vmem [shape: f32[1,128], index: 2, kind: input, shape index: {}]   ;;  %s3112_s3 = inlined_call_operand.hbm [shape: bf16[5,128,256], index: 3, kind: input, shape index: {}]   ;;  %s3113_s4 = inlined_call_operand.vmem [shape: f32[1,128], index: 4, kind: input, shape index: {}]   ;;  %s3114_s5 = inlined_call_operand.hbm [shape: bf16[4,128,128], index: 5, kind: input, shape index: {}]   ;;  %s3115_s6 = inlined_call_operand.vmem [shape: f32[1,128], index: 6, kind: input, shape index: {}]   ;;  %s3116_s7 = inlined_call_operand.vmem [shape: bf16[128,128], index: 7, kind: input, shape index: {}]   ;;  %s3117_s8 = inlined_call_operand.vmem [shape: f32[1,128], index: 8, kind: input, shape index: {}]   ;;  %s3118_s9 = inlined_call_operand.hbm [shape: f32[2,128], index: 9, kind: output, shape index: {}]  }
   0x1   :  { %15 = vsyncpa [#allocation7], 0 }
   0x2   :  { %16 = vsyncpa [#allocation5], 0  ;;  %s2732_s30 = smov [#allocation3]   ;;  %s2660_s13 = scalar_lea.hbm %s3112_s3, 10240 }
   0x3   :  { %s28_s10 = sshll.u32 %s2732_s30, 4  ;;  %p2661_p0 = scmp.ne.s32.totalorder %s3112_s3, %s2660_s13  ;;  %s29_s10 = int_to_ptr.vmem [resolvable:$true] %s28_s10 }
   0x4   :  { %p2664_p1 = scmp.lt.u32.totalorder %s2660_s13, %s3112_s3 }
   0x6   :  { %p2666_p2 = pnand %p2664_p1, %p2661_p0 }
   0x8   :  { %2669 = shalt.err (!%p2666_p2)
}
   0x9   :  { %s2670_s18 = scalar_lea.vmem %s29_s10, 10240  ;;  %p2675_p4 = scmp.lt.s32.totalorder %s29_s10, %s29_s10 }
   0xa   :  { %p2671_p3 = scmp.ne.s32.totalorder %s29_s10, %s2670_s18  ;;  %p2676_p5 = scmp.lt.s32.totalorder %s2670_s18, %s2670_s18 }
   0xc   :  { %p2677_p6 = por %p2676_p5, %p2675_p4 }
   0xe   :  { %p2678_p7 = pnand %p2677_p6, %p2671_p3 }
  0x10   :  { %2681 = shalt.err (!%p2678_p7)
}
  0x11   :  { %s2733_s19 = smov 128   ;;  %s2734_s20 = smov 8  }
  0x12   :  { %34 = dma.hbm_to_vmem [thread:$0]  %s3112_s3, 10240, %s29_s10, [#allocation4], %s2733_s19, %s2733_s19, %s2734_s20  }
  0x13   :  { %s2735_s23 = smov [#allocation6]   ;;  %s2682_s27 = scalar_lea.hbm %s3114_s5, 4096 }
  0x14   :  { %s42_s24 = sshll.u32 %s2735_s23, 4  ;;  %p2683_p8 = scmp.ne.s32.totalorder %s3114_s5, %s2682_s27  ;;  %s43_s24 = int_to_ptr.vmem [resolvable:$true] %s42_s24 }
  0x15   :  { %p2686_p9 = scmp.lt.u32.totalorder %s2682_s27, %s3114_s5 }
  0x17   :  { %p2688_p10 = pnand %p2686_p9, %p2683_p8 }
  0x19   :  { %2691 = shalt.err (!%p2688_p10)
}
  0x1a   :  { %s2692_s12 = scalar_lea.vmem %s43_s24, 4096  ;;  %p2697_p12 = scmp.lt.s32.totalorder %s43_s24, %s43_s24 }
  0x1b   :  { %p2693_p11 = scmp.ne.s32.totalorder %s43_s24, %s2692_s12  ;;  %p2698_p13 = scmp.lt.s32.totalorder %s2692_s12, %s2692_s12 }
  0x1d   :  { %p2699_p0 = por %p2698_p13, %p2697_p12 }
  0x1f   :  { %p2700_p1 = pnand %p2699_p0, %p2693_p11 }
  0x21   :  { %2703 = shalt.err (!%p2700_p1)
}
  0x22   :  { %s2736_s3 = smov 64   ;;  %s2737_s10 = smov 4  }
  0x23   :  { %48 = dma.hbm_to_vmem [thread:$0]  %s3114_s5, 4096, %s43_s24, [#allocation7], %s2736_s3, %s2736_s3, %s2737_s10  }
  0x24   :  { %2726 = dma.done.wait [#allocation4], 10240  }
  0x25   :  { %2727 = vsyncadd [#allocation4], 4294957056 }
  0x26   :  { %2728 = dma.done.wait [#allocation7], 4096  }
  0x27   :  { %2729 = vsyncadd [#allocation7], 4294963200  ;;  %v2738_v0 = vmov 0   ;;  %v2466_v1 = vld [vmem:[%s3110_s1 + $0x24] ss:$8 sps:$4 sm:$0xff]   ;;  %vm118_vm0 = vcmask 1045504  }
  0x28   :  { %157 = vmatprep.mubr.bf16.mxu0 %v2738_v0  ;;  %874 = vmatprep.mubr.bf16.mxu1 %v2738_v0  ;;  %v2468_v2 = vld [vmem:[%s3110_s1 + $0x20] ss:$8 sps:$4 sm:$0xff]   ;;  %v2469_v3 = vld [vmem:[%s3110_s1 + $0x34] ss:$8 sps:$4 sm:$0x3f]   ;;  %vm108_vm1 = vcmask 228352  }
  0x29   :  { %125 = vmatprep.subr.bf16.mxu0 %v2466_v1  ;;  %v2471_v4 = vld [vmem:[%s3110_s1 + $0x30] ss:$8 sps:$4 sm:$0x3f]   ;;  %v76_v5 = vld [vmem:[%s3109_s0 + $0x1] sm:$0xff]  ;;  %vm2740_vm2 = vmmov 0   ;;  %vm1510_vm3 = vcmask 1041409  }
  0x2a   :  { %126 = vmatpush1.bf16.msra.mxu0 %v2468_v2  ;;  %v77_v6 = vld [vmem:[%s3109_s0 + $0x9] sm:$0xff]  ;;  %v120_v7 = vsel %vm118_vm0, %v2471_v4, 0  ;;  %v2475_v11 = vld [vmem:[%s3110_s1 + $0x14] ss:$8 sps:$4 sm:$0x3f]   ;;  %v79_v14 = vld [vmem:[%s3109_s0 + $0x21] sm:$0xff] }
  0x2b   :  { %2075 = vmatprep.subr.msk.bf16.mxu0 %vm118_vm0, %v2469_v3  ;;  %v2474_v8 = vld [vmem:[%s3110_s1 + $0x4] ss:$8 sps:$4 sm:$0xff]   ;;  %v82_v9 = vpack.c.bf16 %v77_v6, %v76_v5  ;;  %v2472_v10 = vld [vmem:[%s3110_s1] ss:$8 sps:$4 sm:$0xff]   ;;  %v78_v13 = vld [vmem:[%s3109_s0 + $0x11] sm:$0xff]  ;;  %vm2037_vm4 = vcmask 1041408  }
  0x2c   :  { %v2477_v12 = vld [vmem:[%s3110_s1 + $0x10] ss:$8 sps:$4 sm:$0x3f]   ;;  %v2480_v16 = vld [vmem:[%s3110_s1 + $0x44] ss:$8 sps:$4 sm:$0xff]   ;;  %v83_v17 = vpack.c.bf16 %v79_v14, %v78_v13 }
  0x2d   :  { %v216_v15 = vsel %vm118_vm0, %v2477_v12, 0  ;;  %v80_v18 = vld [vmem:[%s3109_s0 + $0x29] sm:$0xff]  ;;  %v81_v19 = vld [vmem:[%s3109_s0 + $0x31] sm:$0xff]  ;;  %v63_v21 = vld [vmem:[%s3109_s0] sm:$0xff] }
  0x2e   :  { %128 = vmatpush1.bf16.msra.mxu0 %v120_v7  ;;  %v84_v20 = vpack.c.bf16 %v81_v19, %v80_v18  ;;  %v64_v22 = vld [vmem:[%s3109_s0 + $0x8] sm:$0xff]  ;;  %v2481_v25 = vld [vmem:[%s3110_s1 + $0x54] ss:$8 sps:$4 sm:$0x3f]   ;;  %v66_v28 = vld [vmem:[%s3109_s0 + $0x20] sm:$0xff] }
  0x2f   :  { %221 = vmatprep.subr.bf16.mxu0 %v2474_v8  ;;  %v2478_v23 = vld [vmem:[%s3110_s1 + $0x40] ss:$8 sps:$4 sm:$0xff]   ;;  %v69_v24 = vpack.c.bf16 %v64_v22, %v63_v21  ;;  %v2483_v26 = vld [vmem:[%s3110_s1 + $0x50] ss:$8 sps:$4 sm:$0x3f]  }
  0x30   :  { %v65_v27 = vld [vmem:[%s3109_s0 + $0x10] sm:$0xff]  ;;  %v2486_v29 = vld [vmem:[%s3110_s1 + $0x64] ss:$8 sps:$4 sm:$0xff]   ;;  %v326_v30 = vsel %vm118_vm0, %v2483_v26, 0  ;;  %v2484_v39 = vld [vmem:[%s3110_s1 + $0x60] ss:$8 sps:$4 sm:$0xff]  }
  0x31   :  { %2076 = vmatmul.mubr.msk.bf16.vlgmr.msra.gmra.mrb[0].mxu0 %vm108_vm1, %v82_v9  ;;  %v70_v31 = vpack.c.bf16 %v66_v28, %v65_v27  ;;  %v67_v32 = vld [vmem:[%s3109_s0 + $0x28] sm:$0xff]  ;;  %v68_v33 = vld [vmem:[%s3109_s0 + $0x30] sm:$0xff]  ;;  %v2123_v26 = vld [vmem:[%s3111_s2] ss:$0 sm:$0xff] }
  0x32   :  { %222 = vmatpush1.bf16.msra.mxu0 %v2472_v10  ;;  %167 = vmatprep.mubr.bf16.mxu0 %v2738_v0  ;;  %v2489_v34 = vld [vmem:[%s3110_s1 + $0x70] ss:$8 sps:$4 sm:$0x3f]   ;;  %v71_v35 = vpack.c.bf16 %v68_v33, %v67_v32  ;;  %v284_v36 = vld [vmem:[%s3109_s0 + $0x2] sm:$0xff]  ;;  %v2499_v10 = vld [vmem:[#allocation3 + $0x94] ss:$8 sps:$4 sm:$0xff]  }
  0x33   :  { %2083 = vmatprep.subr.msk.bf16.mxu0 %vm118_vm0, %v2475_v11  ;;  %v285_v37 = vld [vmem:[%s3109_s0 + $0xa] sm:$0xff]  ;;  %v448_v38 = vsel %vm118_vm0, %v2489_v34, 0  ;;  %v2487_v41 = vld [vmem:[%s3110_s1 + $0x74] ss:$8 sps:$4 sm:$0x3f]   ;;  %v287_v43 = vld [vmem:[%s3109_s0 + $0x22] sm:$0xff] }
  0x34   :  { %v290_v40 = vpack.c.bf16 %v285_v37, %v284_v36  ;;  %v286_v42 = vld [vmem:[%s3109_s0 + $0x12] sm:$0xff]  ;;  %v2492_v44 = vld [vmem:[%s3110_s1 + $0x84] ss:$8 sps:$4 sm:$0xff]   ;;  %v2490_v52 = vld [vmem:[%s3110_s1 + $0x80] ss:$8 sps:$4 sm:$0xff]  }
  0x35   :  { %v291_v45 = vpack.c.bf16 %v287_v43, %v286_v42  ;;  %v288_v46 = vld [vmem:[%s3109_s0 + $0x2a] sm:$0xff]  ;;  %v289_v47 = vld [vmem:[%s3109_s0 + $0x32] sm:$0xff] }
  0x36   :  { %224 = vmatpush1.bf16.msra.mxu0 %v216_v15  ;;  %v292_v48 = vpack.c.bf16 %v289_v47, %v288_v46  ;;  %v406_v49 = vld [vmem:[%s3109_s0 + $0x3] sm:$0xff]  ;;  %v407_v50 = vld [vmem:[%s3109_s0 + $0xb] sm:$0xff]  ;;  %v2493_v53 = vld [vmem:[%s3110_s1 + $0x94] ss:$8 sps:$4 sm:$0x3f]  }
  0x37   :  { %331 = vmatprep.subr.bf16.mxu0 %v2480_v16  ;;  %v412_v51 = vpack.c.bf16 %v407_v50, %v406_v49  ;;  %v2495_v54 = vld [vmem:[%s3110_s1 + $0x90] ss:$8 sps:$4 sm:$0x3f]   ;;  %v409_v56 = vld [vmem:[%s3109_s0 + $0x23] sm:$0xff]  ;;  %v2505_v14 = vld [vmem:[#allocation3 + $0xb4] ss:$8 sps:$4 sm:$0xff]  }
  0x38   :  { %v408_v55 = vld [vmem:[%s3109_s0 + $0x13] sm:$0xff]  ;;  %v570_v57 = vsel %vm118_vm0, %v2495_v54, 0  ;;  %v410_v59 = vld [vmem:[%s3109_s0 + $0x2b] sm:$0xff] }
  0x39   :  { %2077 = vmatmul.mubr.msk.bf16.gmra.mrb[4].mxu0 %vm108_vm1, %v83_v17  ;;  %v413_v58 = vpack.c.bf16 %v409_v56, %v408_v55  ;;  %v411_v60 = vld [vmem:[%s3109_s0 + $0x33] sm:$0xff]  ;;  %v528_v62 = vld [vmem:[%s3109_s0 + $0x4] sm:$0xff] }
  0x3a   :  { %177 = vmatprep.mubr.bf16.mxu0 %v2738_v0  ;;  %v414_v61 = vpack.c.bf16 %v411_v60, %v410_v59  ;;  %v529_v63 = vld [vmem:[%s3109_s0 + $0xc] sm:$0xff]  ;;  %v530_v2 = vld [vmem:[%s3109_s0 + $0x14] sm:$0xff]  ;;  %v531_v3 = vld [vmem:[%s3109_s0 + $0x24] sm:$0xff] }
  0x3b   :  { %v534_v1 = vpack.c.bf16 %v529_v63, %v528_v62  ;;  %v535_v4 = vpack.c.bf16 %v531_v3, %v530_v2  ;;  %v532_v5 = vld [vmem:[%s3109_s0 + $0x2c] sm:$0xff]  ;;  %v533_v6 = vld [vmem:[%s3109_s0 + $0x34] sm:$0xff]  ;;  %v2498_v9 = vld [vmem:[#allocation3 + $0x80] ss:$8 sps:$4 sm:$0xff]  }
  0x3c   :  { %v536_v7 = vpack.c.bf16 %v533_v6, %v532_v5  ;;  %v2496_v8 = vld [vmem:[#allocation3 + $0x84] ss:$8 sps:$4 sm:$0xff]   ;;  %v2501_v11 = vld [vmem:[#allocation3 + $0x90] ss:$8 sps:$4 sm:$0xff]   ;;  %v2504_v13 = vld [vmem:[#allocation3 + $0xa0] ss:$8 sps:$4 sm:$0xff]  }
  0x3d   :  { %842 = vmatprep.subr.bf16.mxu1 %v2496_v8  ;;  %v2502_v12 = vld [vmem:[#allocation3 + $0xa4] ss:$8 sps:$4 sm:$0xff]   ;;  %v2507_v15 = vld [vmem:[#allocation3 + $0xb0] ss:$8 sps:$4 sm:$0xff]   ;;  %v2510_v17 = vld [vmem:[#allocation3 + $0xc0] ss:$8 sps:$4 sm:$0xff]  }
  0x3e   :  { %843 = vmatpush1.bf16.msra.mxu1 %v2498_v9  ;;  %v2508_v16 = vld [vmem:[#allocation3 + $0xc4] ss:$8 sps:$4 sm:$0xff]   ;;  %v2511_v18 = vld [vmem:[#allocation3 + $0xd4] ss:$8 sps:$4 sm:$0xff]   ;;  %v2513_v19 = vld [vmem:[#allocation3 + $0xd0] ss:$8 sps:$4 sm:$0xff]  }
  0x3f   :  { %844 = vmatprep.subr.bf16.mxu1 %v2499_v10  ;;  %v2516_v21 = vld [vmem:[#allocation3 + $0xe0] ss:$8 sps:$4 sm:$0xff]   ;;  %v2517_v22 = vld [vmem:[#allocation3 + $0xf4] ss:$8 sps:$4 sm:$0xff]  }
  0x40   :  { %v2520_v5 = vld [vmem:[#allocation3] ss:$8 sps:$4 sm:$0xff]   ;;  %v2525_v9 = vld [vmem:[#allocation3 + $0x14] ss:$8 sps:$4 sm:$0xff]  }
  0x41   :  { %2078 = vmatmul.mubr.msk.bf16.gmra.mrb[8].mxu0 %vm108_vm1, %v84_v20  ;;  %v2514_v20 = vld [vmem:[#allocation3 + $0xe4] ss:$8 sps:$4 sm:$0xff]  }
  0x42   :  { %253 = vmatprep.mubr.bf16.mxu0 %v2738_v0  ;;  %845 = vmatpush1.bf16.msra.mxu1 %v2501_v11  ;;  %v2616_v10 = vld [vmem:[#allocation6 + $0x40] sm:$0xff]   ;;  %v2523_v11 = vld [vmem:[#allocation3 + $0x10] ss:$8 sps:$4 sm:$0xff]  }
  0x43   :  { %846 = vmatprep.subr.bf16.mxu1 %v2502_v12  ;;  %v2528_v12 = vld [vmem:[#allocation3 + $0x24] ss:$8 sps:$4 sm:$0xff]  }
  0x46   :  { %847 = vmatpush1.bf16.msra.mxu1 %v2504_v13  ;;  %v2739_v13 = vmov 0.0  }
  0x47   :  { %848 = vmatprep.subr.bf16.mxu1 %v2505_v14  ;;  %v2618_v14 = vld [vmem:[#allocation6 + $0x48] sm:$0xff]  }
  0x49   :  { %2084 = vmatmul.mubr.msk.bf16.vlgmr.msra.gmra.mrb[0].mxu0 %vm108_vm1, %v69_v24  ;;  %v2522_v24 = vld [vmem:[#allocation3 + $0x4] ss:$8 sps:$4 sm:$0xff]  }
  0x4a   :  { %332 = vmatpush1.bf16.msra.mxu0 %v2478_v23  ;;  %263 = vmatprep.mubr.bf16.mxu0 %v2738_v0  ;;  %v2519_v23 = vld [vmem:[#allocation3 + $0xf0] ss:$8 sps:$4 sm:$0xff]  }
  0x4b   :  { %2095 = vmatprep.subr.msk.bf16.mxu0 %vm118_vm0, %v2481_v25  ;;  %849 = vmatpush1.bf16.msra.mxu1 %v2507_v15  ;;  %v2526_v15 = vld [vmem:[#allocation3 + $0x20] ss:$8 sps:$4 sm:$0xff]  }
  0x4c   :  { %850 = vmatprep.subr.bf16.mxu1 %v2508_v16  ;;  %v2531_v16 = vld [vmem:[#allocation3 + $0x34] ss:$8 sps:$4 sm:$0xff]  }
  0x4e   :  { %334 = vmatpush1.bf16.msra.mxu0 %v326_v30 }
  0x4f   :  { %453 = vmatprep.subr.bf16.mxu0 %v2486_v29  ;;  %851 = vmatpush1.bf16.msra.mxu1 %v2510_v17  ;;  %v2620_v17 = vld [vmem:[#allocation6 + $0x50] sm:$0xff]  }
  0x50   :  { %852 = vmatprep.subr.bf16.mxu1 %v2511_v18  ;;  %v2529_v18 = vld [vmem:[#allocation3 + $0x30] ss:$8 sps:$4 sm:$0xff]  }
  0x51   :  { %2085 = vmatmul.mubr.msk.bf16.gmra.mrb[4].mxu0 %vm108_vm1, %v70_v31 }
  0x52   :  { %273 = vmatprep.mubr.bf16.mxu0 %v2738_v0 }
  0x53   :  { %853 = vmatpush1.bf16.msra.mxu1 %v2513_v19  ;;  %v2534_v19 = vld [vmem:[#allocation3 + $0x44] ss:$8 sps:$4 sm:$0xff]  }
  0x54   :  { %854 = vmatprep.subr.bf16.mxu1 %v2514_v20  ;;  %v2532_v20 = vld [vmem:[#allocation3 + $0x40] ss:$8 sps:$4 sm:$0xff]  }
  0x57   :  { %855 = vmatpush1.bf16.msra.mxu1 %v2516_v21  ;;  %v2537_v21 = vld [vmem:[#allocation3 + $0x54] ss:$8 sps:$4 sm:$0xff]  }
  0x58   :  { %856 = vmatprep.subr.bf16.mxu1 %v2517_v22  ;;  %v2535_v22 = vld [vmem:[#allocation3 + $0x50] ss:$8 sps:$4 sm:$0xff]  }
  0x59   :  { %2086 = vmatmul.mubr.msk.bf16.gmra.mrb[8].mxu0 %vm108_vm1, %v71_v35 }
  0x5a   :  { %363 = vmatprep.mubr.bf16.mxu0 %v2738_v0 }
  0x5b   :  { %857 = vmatpush1.bf16.msra.mxu1 %v2519_v23  ;;  %v2540_v23 = vld [vmem:[#allocation3 + $0x64] ss:$8 sps:$4 sm:$0xff]  }
  0x5c   :  { %965 = vmatprep.subr.bf16.mxu1 %v2522_v24  ;;  %v2538_v24 = vld [vmem:[#allocation3 + $0x60] ss:$8 sps:$4 sm:$0xff]  }
  0x61   :  { %2096 = vmatmul.mubr.msk.bf16.vlgmr.msra.gmra.mrb[0].mxu0 %vm108_vm1, %v290_v40 }
  0x62   :  { %454 = vmatpush1.bf16.msra.mxu0 %v2484_v39  ;;  %373 = vmatprep.mubr.bf16.mxu0 %v2738_v0 }
  0x63   :  { %2107 = vmatprep.subr.msk.bf16.mxu0 %vm118_vm0, %v2487_v41 }
  0x66   :  { %456 = vmatpush1.bf16.msra.mxu0 %v448_v38 }
  0x67   :  { %575 = vmatprep.subr.bf16.mxu0 %v2492_v44 }
  0x69   :  { %2097 = vmatmul.mubr.msk.bf16.gmra.mrb[4].mxu0 %vm108_vm1, %v291_v45 }
  0x6a   :  { %383 = vmatprep.mubr.bf16.mxu0 %v2738_v0 }
  0x71   :  { %2098 = vmatmul.mubr.msk.bf16.gmra.mrb[8].mxu0 %vm108_vm1, %v292_v48 }
  0x72   :  { %485 = vmatprep.mubr.bf16.mxu0 %v2738_v0 }
  0x79   :  { %2108 = vmatmul.mubr.msk.bf16.vlgmr.msra.gmra.mrb[0].mxu0 %vm108_vm1, %v412_v51 }
  0x7a   :  { %576 = vmatpush1.bf16.msra.mxu0 %v2490_v52  ;;  %495 = vmatprep.mubr.bf16.mxu0 %v2738_v0 }
  0x7b   :  { %2119 = vmatprep.subr.msk.bf16.mxu0 %vm118_vm0, %v2493_v53 }
  0x7e   :  { %578 = vmatpush1.bf16.msra.mxu0 %v570_v57 }
  0x7f   :  { %2292 = vmatprep.subr.bf16.mxu0 %v2739_v13 }
  0x81   :  { %2109 = vmatmul.mubr.msk.bf16.gmra.mrb[4].mxu0 %vm108_vm1, %v413_v58 }
  0x82   :  { %505 = vmatprep.mubr.bf16.mxu0 %v2738_v0 }
  0x89   :  { %2110 = vmatmul.mubr.msk.bf16.gmra.mrb[8].mxu0 %vm108_vm1, %v414_v61 }
  0x8a   :  { %607 = vmatprep.mubr.bf16.mxu0 %v2738_v0 }
  0x91   :  { %2120 = vmatmul.mubr.msk.bf16.vlgmr.msra.gmra.mrb[0].mxu0 %vm108_vm1, %v534_v1 }
  0x92   :  { %617 = vmatprep.mubr.bf16.mxu0 %v2738_v0  ;;  %2293 = vmatpush3.bf16.msra.mxu0 %v2616_v10  ;;  %v2598_v10 = vld [vmem:[#allocation3 + $0x220] ss:$8 sps:$4 sm:$0xff]  }
  0x93   :  { %2294 = vmatprep.subr.bf16.mxu0 %v2739_v13 }
  0x96   :  { %2295 = vmatpush3.bf16.msra.mxu0 %v2618_v14  ;;  %v2606_v14 = vld [vmem:[#allocation3 + $0x244] ss:$8 sps:$4 sm:$0xff]  }
  0x97   :  { %2296 = vmatprep.subr.bf16.mxu0 %v2739_v13 }
  0x99   :  { %2121 = vmatmul.mubr.msk.bf16.gmra.mrb[4].mxu0 %vm108_vm1, %v535_v4 }
  0x9a   :  { %627 = vmatprep.mubr.bf16.mxu0 %v2738_v0  ;;  %2297 = vmatpush3.bf16.msra.mxu0 %v2620_v17  ;;  %v2607_v17 = vld [vmem:[#allocation3 + $0x250] ss:$8 sps:$4 sm:$0xff]  }
  0x9b   :  { %2298 = vmatprep.subr.bf16.mxu0 %v2739_v13 }
  0xa1   :  { %2122 = vmatmul.mubr.msk.bf16.gmra.mrb[8].mxu0 %vm108_vm1, %v536_v7 }
  0xa2   :  { %2308 = vmatprep.mubr.msk.bf16.mxu0 %vm2740_vm2, %v2739_v13 }
 0x164   :  { %v609_v25 = vpop.f32.mrb[0].mxu0 }
 0x165   :  { %v611_v27 = vpop.f32.mrb[1].mxu0 }
 0x166   :  { %v650_v28 = vmax.f32 %v609_v25, %v611_v27  ;;  %v613_v29 = vpop.f32.mrb[2].mxu0  ;;  %v2543_v25 = vld [vmem:[#allocation3 + $0x74] ss:$8 sps:$4 sm:$0xff]   ;;  %v2546_v27 = vld [vmem:[#allocation3 + $0x104] ss:$8 sps:$4 sm:$0xff]  }
 0x167   :  { %v615_v30 = vpop.f32.mrb[3].mxu0 }
 0x168   :  { %v662_v31 = vadd.f32 %v2123_v26, %v650_v28  ;;  %v651_v32 = vmax.f32 %v613_v29, %v615_v30  ;;  %v2544_v30 = vld [vmem:[#allocation3 + $0x100] ss:$8 sps:$4 sm:$0xff]  }
 0x16a   :  { %v670_v33 = vrot.slane %v662_v31, 1  ;;  %v663_v34 = vadd.f32 %v2123_v26, %v651_v32  ;;  %v2549_v32 = vld [vmem:[#allocation3 + $0x114] ss:$8 sps:$4 sm:$0xff]  }
 0x16c   :  { %v674_v35 = vmax.f32 %v662_v31, %v670_v33  ;;  %v688_v36 = vrot.slane %v663_v34, 1  ;;  %v619_v37 = vpop.f32.mrb[4].mxu0  ;;  %v2547_v33 = vld [vmem:[#allocation3 + $0x110] ss:$8 sps:$4 sm:$0xff]  }
 0x16d   :  { %v621_v38 = vpop.f32.mrb[5].mxu0 }
 0x16e   :  { %v676_v39 = vmax.f32 %v674_v35, 0.0  ;;  %v692_v40 = vmax.f32 %v663_v34, %v688_v36  ;;  %v652_v41 = vmax.f32 %v619_v37, %v621_v38  ;;  %v623_v42 = vpop.f32.mrb[6].mxu0  ;;  %v2552_v34 = vld [vmem:[#allocation3 + $0x124] ss:$8 sps:$4 sm:$0xff]   ;;  %v2550_v35 = vld [vmem:[#allocation3 + $0x120] ss:$8 sps:$4 sm:$0xff]  }
 0x16f   :  { %v625_v43 = vpop.f32.mrb[7].mxu0  ;;  %v2555_v36 = vld [vmem:[#allocation3 + $0x134] ss:$8 sps:$4 sm:$0xff]   ;;  %v2553_v37 = vld [vmem:[#allocation3 + $0x130] ss:$8 sps:$4 sm:$0xff]  }
 0x170   :  { %678 = vst [vmem:[#allocation2] sm:$0x1] %v676_v39  ;;  %680 = vst [vmem:[#allocation2 - $0x1] sm:$0x4] %v676_v39  ;;  %v694_v44 = vmax.f32 %v692_v40, 0.0  ;;  %v664_v45 = vadd.f32 %v2123_v26, %v652_v41  ;;  %v653_v46 = vmax.f32 %v623_v42, %v625_v43 }
 0x171   :  { %682 = vst [vmem:[#allocation2 - $0x2] sm:$0x10] %v676_v39  ;;  %684 = vst [vmem:[#allocation2 - $0x3] sm:$0x40] %v676_v39  ;;  %v2558_v38 = vld [vmem:[#allocation3 + $0x144] ss:$8 sps:$4 sm:$0xff]  }
 0x172   :  { %696 = vst [vmem:[#allocation2 + $0x4] sm:$0x1] %v694_v44  ;;  %698 = vst [vmem:[#allocation2 + $0x3] sm:$0x4] %v694_v44  ;;  %v706_v47 = vrot.slane %v664_v45, 1  ;;  %v665_v48 = vadd.f32 %v2123_v26, %v653_v46 }
 0x173   :  { %700 = vst [vmem:[#allocation2 + $0x2] sm:$0x10] %v694_v44  ;;  %702 = vst [vmem:[#allocation2 + $0x1] sm:$0x40] %v694_v44  ;;  %v2556_v39 = vld [vmem:[#allocation3 + $0x140] ss:$8 sps:$4 sm:$0xff]  }
 0x174   :  { %v710_v49 = vmax.f32 %v664_v45, %v706_v47  ;;  %v671_v50 = vrot.slane %v665_v48, 1  ;;  %v629_v51 = vpop.f32.mrb[8].mxu0  ;;  %v2561_v40 = vld [vmem:[#allocation3 + $0x154] ss:$8 sps:$4 sm:$0xff]   ;;  %v2559_v41 = vld [vmem:[#allocation3 + $0x150] ss:$8 sps:$4 sm:$0xff]  }
 0x175   :  { %v631_v52 = vpop.f32.mrb[9].mxu0  ;;  %v2564_v42 = vld [vmem:[#allocation3 + $0x164] ss:$8 sps:$4 sm:$0xff]   ;;  %v2562_v43 = vld [vmem:[#allocation3 + $0x160] ss:$8 sps:$4 sm:$0xff]  }
 0x176   :  { %v712_v53 = vmax.f32 %v710_v49, 0.0  ;;  %v675_v54 = vmax.f32 %v665_v48, %v671_v50  ;;  %v654_v55 = vmax.f32 %v629_v51, %v631_v52  ;;  %v633_v56 = vpop.f32.mrb[10].mxu0  ;;  %v2567_v44 = vld [vmem:[#allocation3 + $0x174] ss:$8 sps:$4 sm:$0xff]   ;;  %v2565_v45 = vld [vmem:[#allocation3 + $0x170] ss:$8 sps:$4 sm:$0xff]  }
 0x177   :  { %v635_v57 = vpop.f32.mrb[11].mxu0  ;;  %v2570_v46 = vld [vmem:[#allocation3 + $0x184] ss:$8 sps:$4 sm:$0xff]   ;;  %v2568_v49 = vld [vmem:[#allocation3 + $0x180] ss:$8 sps:$4 sm:$0xff]  }
 0x178   :  { %714 = vst [vmem:[#allocation2 + $0x8] sm:$0x1] %v712_v53  ;;  %716 = vst [vmem:[#allocation2 + $0x7] sm:$0x4] %v712_v53  ;;  %v677_v58 = vmax.f32 %v675_v54, 0.0  ;;  %v666_v59 = vadd.f32 %v2123_v26, %v654_v55  ;;  %v655_v60 = vmax.f32 %v633_v56, %v635_v57 }
 0x179   :  { %718 = vst [vmem:[#allocation2 + $0x6] sm:$0x10] %v712_v53  ;;  %720 = vst [vmem:[#allocation2 + $0x5] sm:$0x40] %v712_v53  ;;  %v2573_v51 = vld [vmem:[#allocation3 + $0x194] ss:$8 sps:$4 sm:$0xff]  }
 0x17a   :  { %679 = vst [vmem:[#allocation2 + $0x10] sm:$0x1] %v677_v58  ;;  %681 = vst [vmem:[#allocation2 + $0xf] sm:$0x4] %v677_v58  ;;  %v689_v61 = vrot.slane %v666_v59, 1  ;;  %v667_v62 = vadd.f32 %v2123_v26, %v655_v60  ;;  %v723_v29 = vld [vmem:[#allocation2] sm:$0xff] }
 0x17b   :  { %683 = vst [vmem:[#allocation2 + $0xe] sm:$0x10] %v677_v58  ;;  %685 = vst [vmem:[#allocation2 + $0xd] sm:$0x40] %v677_v58  ;;  %v2541_v26 = vld [vmem:[#allocation3 + $0x70] ss:$8 sps:$4 sm:$0xff]  }
 0x17c   :  { %v693_v63 = vmax.f32 %v666_v59, %v689_v61  ;;  %v707_v1 = vrot.slane %v667_v62, 1  ;;  %v2571_v52 = vld [vmem:[#allocation3 + $0x190] ss:$8 sps:$4 sm:$0xff]   ;;  %v2576_v53 = vld [vmem:[#allocation3 + $0x1a4] ss:$8 sps:$4 sm:$0xff]  }
 0x17d   :  { %v2574_v54 = vld [vmem:[#allocation3 + $0x1a0] ss:$8 sps:$4 sm:$0xff]   ;;  %v2579_v55 = vld [vmem:[#allocation3 + $0x1b4] ss:$8 sps:$4 sm:$0xff]   ;;  %v2577_v56 = vld [vmem:[#allocation3 + $0x1b0] ss:$8 sps:$4 sm:$0xff]  }
 0x17e   :  { %v695_v2 = vmax.f32 %v693_v63, 0.0  ;;  %v711_v3 = vmax.f32 %v667_v62, %v707_v1  ;;  %v2582_v57 = vld [vmem:[#allocation3 + $0x1c4] ss:$8 sps:$4 sm:$0xff]   ;;  %v2580_v58 = vld [vmem:[#allocation3 + $0x1c0] ss:$8 sps:$4 sm:$0xff]  }
 0x17f   :  { %v742_v6 = vld [vmem:[#allocation2 + $0x1] sm:$0xff]  ;;  %v2585_v59 = vld [vmem:[#allocation3 + $0x1d4] ss:$8 sps:$4 sm:$0xff]   ;;  %v2583_v60 = vld [vmem:[#allocation3 + $0x1d0] ss:$8 sps:$4 sm:$0xff]  }
 0x180   :  { %697 = vst [vmem:[#allocation2 + $0x14] sm:$0x1] %v695_v2  ;;  %699 = vst [vmem:[#allocation2 + $0x13] sm:$0x4] %v695_v2  ;;  %v713_v4 = vmax.f32 %v711_v3, 0.0  ;;  %v1008_v48 = vld [vmem:[#allocation2 + $0x2] sm:$0xff] }
 0x181   :  { %701 = vst [vmem:[#allocation2 + $0x12] sm:$0x10] %v695_v2  ;;  %703 = vst [vmem:[#allocation2 + $0x11] sm:$0x40] %v695_v2  ;;  %v2588_v61 = vld [vmem:[#allocation3 + $0x1e4] ss:$8 sps:$4 sm:$0xff]  }
 0x182   :  { %715 = vst [vmem:[#allocation2 + $0x18] sm:$0x1] %v713_v4  ;;  %717 = vst [vmem:[#allocation2 + $0x17] sm:$0x4] %v713_v4  ;;  %v2586_v62 = vld [vmem:[#allocation3 + $0x1e0] ss:$8 sps:$4 sm:$0xff]  }
 0x183   :  { %719 = vst [vmem:[#allocation2 + $0x16] sm:$0x10] %v713_v4  ;;  %721 = vst [vmem:[#allocation2 + $0x15] sm:$0x40] %v713_v4  ;;  %v2591_v63 = vld [vmem:[#allocation3 + $0x1f4] ss:$8 sps:$4 sm:$0xff]  }
 0x184   :  { %v2589_v1 = vld [vmem:[#allocation3 + $0x1f0] ss:$8 sps:$4 sm:$0xff]   ;;  %v2594_v2 = vld [vmem:[#allocation3 + $0x204] ss:$8 sps:$4 sm:$0xff]  }
 0x185   :  { %v1155_v4 = vld [vmem:[#allocation2 + $0x3] sm:$0xff] }
 0x188   :  { %v724_v28 = vld [vmem:[#allocation2 + $0x10] sm:$0xff] }
 0x189   :  { %v743_v7 = vld [vmem:[#allocation2 + $0x11] sm:$0xff]  ;;  %v725_v31 = vpack.c.bf16 %v724_v28, %v723_v29  ;;  %v2624_v29 = vld [vmem:[#allocation6 + $0x60] sm:$0xff]  }
 0x18a   :  { %v744_v8 = vpack.c.bf16 %v743_v7, %v742_v6  ;;  %v1009_v47 = vld [vmem:[#allocation2 + $0x12] sm:$0xff] }
 0x18b   :  { %v1010_v50 = vpack.c.bf16 %v1009_v47, %v1008_v48  ;;  %v1156_v3 = vld [vmem:[#allocation2 + $0x13] sm:$0xff] }
 0x18c   :  { %875 = vmatmul.mubr.bf16.vlgmr.msra.gmra.mrb[0].mxu1 %v744_v8  ;;  %v1157_v6 = vpack.c.bf16 %v1156_v3, %v1155_v4  ;;  %v2597_v7 = vld [vmem:[#allocation3 + $0x214] ss:$8 sps:$4 sm:$0xff]   ;;  %v2595_v8 = vld [vmem:[#allocation3 + $0x210] ss:$8 sps:$4 sm:$0xff]  }
 0x18d   :  { %966 = vmatpush1.bf16.msra.mxu1 %v2520_v5  ;;  %997 = vmatprep.mubr.bf16.mxu1 %v2738_v0  ;;  %v2592_v5 = vld [vmem:[#allocation3 + $0x200] ss:$8 sps:$4 sm:$0xff]   ;;  %v2623_v28 = vld [vmem:[#allocation6 + $0x98] sm:$0xff]  }
 0x18e   :  { %967 = vmatprep.subr.bf16.mxu1 %v2525_v9  ;;  %v2600_v9 = vld [vmem:[#allocation3 + $0x224] ss:$8 sps:$4 sm:$0xff]  }
 0x191   :  { %968 = vmatpush1.bf16.msra.mxu1 %v2523_v11  ;;  %v2603_v11 = vld [vmem:[#allocation3 + $0x234] ss:$8 sps:$4 sm:$0xff]  }
 0x192   :  { %969 = vmatprep.subr.bf16.mxu1 %v2528_v12  ;;  %v2601_v12 = vld [vmem:[#allocation3 + $0x230] ss:$8 sps:$4 sm:$0xff]  }
 0x195   :  { %970 = vmatpush1.bf16.msra.mxu1 %v2526_v15  ;;  %v2604_v15 = vld [vmem:[#allocation3 + $0x240] ss:$8 sps:$4 sm:$0xff]  }
 0x196   :  { %971 = vmatprep.subr.bf16.mxu1 %v2531_v16  ;;  %v2609_v16 = vld [vmem:[#allocation3 + $0x254] ss:$8 sps:$4 sm:$0xff]  }
 0x199   :  { %972 = vmatpush1.bf16.msra.mxu1 %v2529_v18  ;;  %v2612_v18 = vld [vmem:[#allocation3 + $0x264] ss:$8 sps:$4 sm:$0xff]  }
 0x19a   :  { %973 = vmatprep.subr.bf16.mxu1 %v2534_v19  ;;  %v2615_v19 = vld [vmem:[#allocation3 + $0x274] ss:$8 sps:$4 sm:$0xff]  }
 0x19d   :  { %974 = vmatpush1.bf16.msra.mxu1 %v2532_v20  ;;  %v2613_v20 = vld [vmem:[#allocation3 + $0x270] ss:$8 sps:$4 sm:$0xff]  }
 0x19e   :  { %975 = vmatprep.subr.bf16.mxu1 %v2537_v21  ;;  %v1303_v21 = vld [vmem:[#allocation2 + $0x14] sm:$0xff] }
 0x1a1   :  { %976 = vmatpush1.bf16.msra.mxu1 %v2535_v22  ;;  %v1302_v22 = vld [vmem:[#allocation2 + $0x4] sm:$0xff] }
 0x1a2   :  { %977 = vmatprep.subr.bf16.mxu1 %v2540_v23  ;;  %v2617_v23 = vld [vmem:[#allocation6 + $0x80] sm:$0xff]  }
 0x1a5   :  { %978 = vmatpush1.bf16.msra.mxu1 %v2538_v24  ;;  %v1304_v24 = vpack.c.bf16 %v1303_v21, %v1302_v22  ;;  %v2646_v21 = vld [vmem:[#allocation6 + $0xf0] sm:$0xff]   ;;  %v2647_v22 = vld [vmem:[#allocation6 + $0xf8] sm:$0xff]  }
 0x1a6   :  { %979 = vmatprep.subr.bf16.mxu1 %v2543_v25  ;;  %v2619_v25 = vld [vmem:[#allocation6 + $0x88] sm:$0xff]  }
 0x1a9   :  { %980 = vmatpush1.bf16.msra.mxu1 %v2541_v26  ;;  %v2621_v26 = vld [vmem:[#allocation6 + $0x90] sm:$0xff]  }
 0x1aa   :  { %1108 = vmatprep.subr.bf16.mxu1 %v2546_v27  ;;  %v2622_v27 = vld [vmem:[#allocation6 + $0x58] sm:$0xff]  }
 0x1ab   :  { %2299 = vmatpush3.bf16.msra.mxu0 %v2622_v27  ;;  %v2651_v27 = vld [vmem:[%s3116_s7 + $0x18] sm:$0xff]  }
 0x1ac   :  { %998 = vmatmul.mubr.bf16.vlgmr.msra.gmra.mrb[0].mxu1 %v725_v31  ;;  %2300 = vmatprep.subr.bf16.mxu0 %v2739_v13  ;;  %v2626_v31 = vld [vmem:[#allocation6 + $0x68] sm:$0xff]  }
 0x1ad   :  { %1109 = vmatpush1.bf16.msra.mxu1 %v2544_v30  ;;  %1140 = vmatprep.mubr.bf16.mxu1 %v2738_v0  ;;  %v2625_v30 = vld [vmem:[#allocation6 + $0xa0] sm:$0xff]  }
 0x1ae   :  { %1110 = vmatprep.subr.bf16.mxu1 %v2549_v32  ;;  %v2627_v32 = vld [vmem:[#allocation6 + $0xa8] sm:$0xff]  }
 0x1af   :  { %2301 = vmatpush3.bf16.msra.mxu0 %v2624_v29  ;;  %v2653_v29 = vld [vmem:[%s3116_s7 + $0x28] sm:$0xff]  }
 0x1b0   :  { %2302 = vmatprep.subr.bf16.mxu0 %v2739_v13 }
 0x1b1   :  { %1111 = vmatpush1.bf16.msra.mxu1 %v2547_v33  ;;  %v2628_v33 = vld [vmem:[#allocation6 + $0x70] sm:$0xff]  }
 0x1b2   :  { %1112 = vmatprep.subr.bf16.mxu1 %v2552_v34  ;;  %v2629_v34 = vld [vmem:[#allocation6 + $0xb0] sm:$0xff]  }
 0x1b3   :  { %2303 = vmatpush3.bf16.msra.mxu0 %v2626_v31  ;;  %v2655_v31 = vld [vmem:[%s3116_s7 + $0x38] sm:$0xff]  }
 0x1b4   :  { %2304 = vmatprep.subr.bf16.mxu0 %v2739_v13 }
 0x1b5   :  { %1113 = vmatpush1.bf16.msra.mxu1 %v2550_v35  ;;  %v2630_v35 = vld [vmem:[#allocation6 + $0x78] sm:$0xff]  }
 0x1b6   :  { %1114 = vmatprep.subr.bf16.mxu1 %v2555_v36  ;;  %v2631_v36 = vld [vmem:[#allocation6 + $0xb8] sm:$0xff]  }
 0x1b7   :  { %2305 = vmatpush3.bf16.msra.mxu0 %v2628_v33 }
 0x1b8   :  { %2306 = vmatprep.subr.bf16.mxu0 %v2739_v13 }
 0x1b9   :  { %1115 = vmatpush1.bf16.msra.mxu1 %v2553_v37 }
 0x1ba   :  { %1116 = vmatprep.subr.bf16.mxu1 %v2558_v38  ;;  %v2204_v38 = vld [vmem:[%s3113_s4] ss:$0 sm:$0xff] }
 0x1bb   :  { %2307 = vmatpush3.bf16.msra.mxu0 %v2630_v35 }
 0x1bc   :  { %2312 = vmatprep.subr.bf16.mxu0 %v2739_v13 }
 0x1bd   :  { %1117 = vmatpush1.bf16.msra.mxu1 %v2556_v39 }
 0x1be   :  { %1118 = vmatprep.subr.bf16.mxu1 %v2561_v40 }
 0x1c1   :  { %1119 = vmatpush1.bf16.msra.mxu1 %v2559_v41 }
 0x1c2   :  { %1120 = vmatprep.subr.bf16.mxu1 %v2564_v42 }
 0x1c5   :  { %1121 = vmatpush1.bf16.msra.mxu1 %v2562_v43 }
 0x1c6   :  { %1122 = vmatprep.subr.bf16.mxu1 %v2567_v44 }
 0x1c9   :  { %1123 = vmatpush1.bf16.msra.mxu1 %v2565_v45 }
 0x1ca   :  { %1255 = vmatprep.subr.bf16.mxu1 %v2570_v46 }
 0x1cc   :  { %1141 = vmatmul.mubr.bf16.vlgmr.msra.gmra.mrb[0].mxu1 %v1010_v50 }
 0x1cd   :  { %1256 = vmatpush1.bf16.msra.mxu1 %v2568_v49  ;;  %1287 = vmatprep.mubr.bf16.mxu1 %v2738_v0 }
 0x1ce   :  { %1257 = vmatprep.subr.bf16.mxu1 %v2573_v51 }
 0x1d1   :  { %1258 = vmatpush1.bf16.msra.mxu1 %v2571_v52 }
 0x1d2   :  { %1259 = vmatprep.subr.bf16.mxu1 %v2576_v53 }
 0x1d5   :  { %1260 = vmatpush1.bf16.msra.mxu1 %v2574_v54 }
 0x1d6   :  { %1261 = vmatprep.subr.bf16.mxu1 %v2579_v55 }
 0x1d9   :  { %1262 = vmatpush1.bf16.msra.mxu1 %v2577_v56 }
 0x1da   :  { %1263 = vmatprep.subr.bf16.mxu1 %v2582_v57 }
 0x1dd   :  { %1264 = vmatpush1.bf16.msra.mxu1 %v2580_v58 }
 0x1de   :  { %1265 = vmatprep.subr.bf16.mxu1 %v2585_v59 }
 0x1e1   :  { %1266 = vmatpush1.bf16.msra.mxu1 %v2583_v60 }
 0x1e2   :  { %1267 = vmatprep.subr.bf16.mxu1 %v2588_v61 }
 0x1e5   :  { %1268 = vmatpush1.bf16.msra.mxu1 %v2586_v62 }
 0x1e6   :  { %1269 = vmatprep.subr.bf16.mxu1 %v2591_v63 }
 0x1e9   :  { %1270 = vmatpush1.bf16.msra.mxu1 %v2589_v1  ;;  %v2632_v1 = vld [vmem:[#allocation6] sm:$0xff]  }
 0x1ea   :  { %1402 = vmatprep.subr.bf16.mxu1 %v2594_v2 }
 0x1ec   :  { %1288 = vmatmul.mubr.bf16.vlgmr.msra.gmra.mrb[0].mxu1 %v1157_v6 }
 0x1ed   :  { %1403 = vmatpush1.bf16.msra.mxu1 %v2592_v5  ;;  %1434 = vmatprep.mubr.bf16.mxu1 %v2738_v0  ;;  %v2610_v0 = vld [vmem:[#allocation3 + $0x260] ss:$8 sps:$4 sm:$0xff]  }
 0x1ee   :  { %1404 = vmatprep.subr.bf16.mxu1 %v2597_v7  ;;  %v2633_v7 = vld [vmem:[#allocation6 + $0x8] sm:$0xff]  }
 0x1f1   :  { %1405 = vmatpush1.bf16.msra.mxu1 %v2595_v8  ;;  %v2634_v8 = vld [vmem:[#allocation6 + $0x10] sm:$0xff]  }
 0x1f2   :  { %1406 = vmatprep.subr.bf16.mxu1 %v2600_v9  ;;  %v2635_v9 = vld [vmem:[#allocation6 + $0x18] sm:$0xff]  }
 0x1f5   :  { %1407 = vmatpush1.bf16.msra.mxu1 %v2598_v10  ;;  %v2636_v10 = vld [vmem:[#allocation6 + $0x20] sm:$0xff]  }
 0x1f6   :  { %1408 = vmatprep.subr.bf16.mxu1 %v2603_v11  ;;  %v2637_v11 = vld [vmem:[#allocation6 + $0x28] sm:$0xff]  }
 0x1f9   :  { %1409 = vmatpush1.bf16.msra.mxu1 %v2601_v12  ;;  %v2638_v12 = vld [vmem:[#allocation6 + $0x30] sm:$0xff]  }
 0x1fa   :  { %1410 = vmatprep.subr.bf16.mxu1 %v2606_v14  ;;  %v2639_v14 = vld [vmem:[#allocation6 + $0x38] sm:$0xff]  }
 0x1fd   :  { %1411 = vmatpush1.bf16.msra.mxu1 %v2604_v15  ;;  %v2640_v15 = vld [vmem:[#allocation6 + $0xc0] sm:$0xff]  }
 0x1fe   :  { %1412 = vmatprep.subr.bf16.mxu1 %v2609_v16 }
 0x201   :  { %1413 = vmatpush1.bf16.msra.mxu1 %v2607_v17  ;;  %v2641_v17 = vld [vmem:[#allocation6 + $0xc8] sm:$0xff]  }
 0x202   :  { %1414 = vmatprep.subr.bf16.mxu1 %v2612_v18  ;;  %v2642_v18 = vld [vmem:[#allocation6 + $0xd0] sm:$0xff]  }
 0x205   :  { %1415 = vmatpush1.bf16.msra.mxu1 %v2610_v0  ;;  %v2643_v0 = vld [vmem:[#allocation6 + $0xd8] sm:$0xff]  }
 0x206   :  { %1416 = vmatprep.subr.bf16.mxu1 %v2615_v19  ;;  %v2644_v19 = vld [vmem:[#allocation6 + $0xe0] sm:$0xff]  }
 0x209   :  { %1417 = vmatpush1.bf16.msra.mxu1 %v2613_v20  ;;  %v2645_v20 = vld [vmem:[#allocation6 + $0xe8] sm:$0xff]  }
 0x20a   :  { %2332 = vmatprep.subr.bf16.mxu1 %v2739_v13 }
 0x20c   :  { %1435 = vmatmul.mubr.bf16.vlgmr.msra.gmra.mrb[0].mxu1 %v1304_v24  ;;  %v2648_v24 = vld [vmem:[%s3116_s7] sm:$0xff]  }
 0x20d   :  { %2333 = vmatpush3.bf16.msra.mxu1 %v2617_v23  ;;  %2348 = vmatprep.mubr.msk.bf16.mxu1 %vm2740_vm2, %v2739_v13 }
 0x20e   :  { %2334 = vmatprep.subr.bf16.mxu1 %v2739_v13 }
 0x211   :  { %2335 = vmatpush3.bf16.msra.mxu1 %v2619_v25  ;;  %v2649_v25 = vld [vmem:[%s3116_s7 + $0x8] sm:$0xff]  }
 0x212   :  { %2336 = vmatprep.subr.bf16.mxu1 %v2739_v13 }
 0x215   :  { %2337 = vmatpush3.bf16.msra.mxu1 %v2621_v26  ;;  %v2650_v26 = vld [vmem:[%s3116_s7 + $0x10] sm:$0xff]  }
 0x216   :  { %2338 = vmatprep.subr.bf16.mxu1 %v2739_v13 }
 0x219   :  { %2339 = vmatpush3.bf16.msra.mxu1 %v2623_v28  ;;  %v2652_v28 = vld [vmem:[%s3116_s7 + $0x20] sm:$0xff]  }
 0x21a   :  { %2340 = vmatprep.subr.bf16.mxu1 %v2739_v13 }
 0x21d   :  { %2341 = vmatpush3.bf16.msra.mxu1 %v2625_v30  ;;  %v2654_v30 = vld [vmem:[%s3116_s7 + $0x30] sm:$0xff]  }
 0x21e   :  { %2342 = vmatprep.subr.bf16.mxu1 %v2739_v13 }
 0x221   :  { %2343 = vmatpush3.bf16.msra.mxu1 %v2627_v32 }
 0x222   :  { %2344 = vmatprep.subr.bf16.mxu1 %v2739_v13 }
 0x225   :  { %2345 = vmatpush3.bf16.msra.mxu1 %v2629_v34 }
 0x226   :  { %2346 = vmatprep.subr.bf16.mxu1 %v2739_v13 }
 0x229   :  { %2347 = vmatpush3.bf16.msra.mxu1 %v2631_v36 }
 0x22a   :  { %2372 = vmatprep.subr.bf16.mxu1 %v2739_v13 }
 0x2df   :  { %v1436_v37 = vpop.f32.mrb[0].mxu1 }
 0x2e0   :  { %v1438_v39 = vpop.f32.mrb[1].mxu1 }
 0x2e1   :  { %v1449_v40 = vmax.f32 %v1436_v37, %v1438_v39  ;;  %v1440_v41 = vpop.f32.mrb[2].mxu1 }
 0x2e2   :  { %v1442_v42 = vpop.f32.mrb[3].mxu1 }
 0x2e3   :  { %v1457_v43 = vadd.f32 %v2204_v38, %v1449_v40  ;;  %v1450_v44 = vmax.f32 %v1440_v41, %v1442_v42 }
 0x2e5   :  { %v1461_v45 = vrot.slane %v1457_v43, 1  ;;  %v1458_v46 = vadd.f32 %v2204_v38, %v1450_v44 }
 0x2e7   :  { %v1465_v47 = vmax.f32 %v1457_v43, %v1461_v45  ;;  %v1462_v48 = vrot.slane %v1458_v46, 1 }
 0x2e9   :  { %v1467_v49 = vmax.f32 %v1465_v47, 0.0  ;;  %v1466_v50 = vmax.f32 %v1458_v46, %v1462_v48  ;;  %v2237_v46 = vld [vmem:[%s3115_s6] ss:$0 sm:$0xff]  ;;  %s2741_s6 = smov [#allocation8]  }
 0x2eb   :  { %v1469_v51 = vpack.c.bf16 %v1467_v49, %v1467_v49  ;;  %v1468_v52 = vmax.f32 %v1466_v50, 0.0 }
 0x2ed   :  { %v1506_v53 = vunpack.c.l.b16 %v1469_v51  ;;  %v1470_v54 = vpack.c.bf16 %v1468_v52, %v1468_v52 }
 0x2ef   :  { %v1507_v55 = vunpack.c.l.b16 %v1470_v54  ;;  %v1508_v56 = vrot.slane %v1506_v53, 2  ;;  %v1711_v57 = vrot.slane %v1506_v53, 4  ;;  %v1822_v58 = vrot.slane %v1506_v53, 6  ;;  %v2238_v54 = vld [vmem:[%s3117_s8] ss:$0 sm:$0xff]  ;;  %s2057_s8 = sshll.u32 %s2741_s6, 4  ;;  %s2058_s8 = int_to_ptr.vmem [resolvable:$true] %s2057_s8 }
 0x2f0   :  { %s2704_s18 = scalar_lea.vmem %s2058_s8, 32  ;;  %p2709_p3 = scmp.lt.s32.totalorder %s2058_s8, %s2058_s8 }
 0x2f1   :  { %v1509_v59 = vrot.slane %v1507_v55, 1  ;;  %v1712_v60 = vrot.slane %v1507_v55, 3  ;;  %v1602_v61 = vrot.slane %v1507_v55, 7  ;;  %v1823_v62 = vrot.slane %v1507_v55, 5  ;;  %p2705_p2 = scmp.ne.s32.totalorder %s2058_s8, %s2704_s18  ;;  %p2710_p4 = scmp.lt.s32.totalorder %s2704_s18, %s2704_s18 }
 0x2f3   :  { %v1511_v63 = vsel %vm1510_vm3, %v1509_v59, %v1508_v56  ;;  %v1713_v2 = vsel %vm1510_vm3, %v1712_v60, %v1711_v57  ;;  %v1603_v3 = vsel %vm1510_vm3, %v1602_v61, %v1506_v53  ;;  %v1824_v4 = vsel %vm1510_vm3, %v1823_v62, %v1822_v58  ;;  %p2711_p5 = por %p2710_p4, %p2709_p3 }
 0x2f4   :  { %v1512_v5 = vpack.c.b16 %v1511_v63, %v1511_v63  ;;  %v1714_v6 = vpack.c.b16 %v1713_v2, %v1713_v2  ;;  %v1604_v16 = vpack.c.b16 %v1603_v3, %v1603_v3  ;;  %v1825_v23 = vpack.c.b16 %v1824_v4, %v1824_v4 }
 0x2f5   :  { %p2712_p6 = pnand %p2711_p5, %p2705_p2 }
 0x2f6   :  { %2309 = vmatmul.mubr.bf16.vlgmr.msra.gmra.mrb[12].mxu0 %v1512_v5  ;;  %2349 = vmatmul.mubr.bf16.vlgmr.msra.gmra.mrb[4].mxu1 %v1714_v6 }
 0x2f7   :  { %2313 = vmatpush3.bf16.msra.mxu0 %v2632_v1  ;;  %2328 = vmatprep.mubr.msk.bf16.mxu0 %vm2740_vm2, %v2739_v13 }
 0x2f8   :  { %2314 = vmatprep.subr.bf16.mxu0 %v2739_v13  ;;  %2388 = vmatprep.mubr.msk.bf16.mxu1 %vm2740_vm2, %v2739_v13 }
 0x2f9   :  { %2373 = vmatpush3.bf16.msra.mxu1 %v2648_v24 }
 0x2fa   :  { %2374 = vmatprep.subr.bf16.mxu1 %v2739_v13 }
 0x2fb   :  { %2315 = vmatpush3.bf16.msra.mxu0 %v2633_v7 }
 0x2fc   :  { %2316 = vmatprep.subr.bf16.mxu0 %v2739_v13 }
 0x2fd   :  { %2375 = vmatpush3.bf16.msra.mxu1 %v2649_v25 }
 0x2fe   :  { %2376 = vmatprep.subr.bf16.mxu1 %v2739_v13 }
 0x2ff   :  { %2317 = vmatpush3.bf16.msra.mxu0 %v2634_v8 }
 0x300   :  { %2318 = vmatprep.subr.bf16.mxu0 %v2739_v13 }
 0x301   :  { %2377 = vmatpush3.bf16.msra.mxu1 %v2650_v26 }
 0x302   :  { %2378 = vmatprep.subr.bf16.mxu1 %v2739_v13 }
 0x303   :  { %2319 = vmatpush3.bf16.msra.mxu0 %v2635_v9 }
 0x304   :  { %2320 = vmatprep.subr.bf16.mxu0 %v2739_v13 }
 0x305   :  { %2379 = vmatpush3.bf16.msra.mxu1 %v2651_v27 }
 0x306   :  { %2380 = vmatprep.subr.bf16.mxu1 %v2739_v13 }
 0x307   :  { %2321 = vmatpush3.bf16.msra.mxu0 %v2636_v10 }
 0x308   :  { %2322 = vmatprep.subr.bf16.mxu0 %v2739_v13 }
 0x309   :  { %2381 = vmatpush3.bf16.msra.mxu1 %v2652_v28 }
 0x30a   :  { %2382 = vmatprep.subr.bf16.mxu1 %v2739_v13 }
 0x30b   :  { %2323 = vmatpush3.bf16.msra.mxu0 %v2637_v11 }
 0x30c   :  { %2324 = vmatprep.subr.bf16.mxu0 %v2739_v13 }
 0x30d   :  { %2383 = vmatpush3.bf16.msra.mxu1 %v2653_v29 }
 0x30e   :  { %2384 = vmatprep.subr.bf16.mxu1 %v2739_v13 }
 0x30f   :  { %2325 = vmatpush3.bf16.msra.mxu0 %v2638_v12 }
 0x310   :  { %2326 = vmatprep.subr.bf16.mxu0 %v2739_v13 }
 0x311   :  { %2385 = vmatpush3.bf16.msra.mxu1 %v2654_v30 }
 0x312   :  { %2386 = vmatprep.subr.bf16.mxu1 %v2739_v13 }
 0x313   :  { %2327 = vmatpush3.bf16.msra.mxu0 %v2639_v14 }
 0x314   :  { %2352 = vmatprep.subr.bf16.mxu0 %v2739_v13 }
 0x315   :  { %2387 = vmatpush3.bf16.msra.mxu1 %v2655_v31 }
 0x316   :  { %2329 = vmatmul.mubr.bf16.vlgmr.msra.gmra.mrb[16].mxu0 %v1604_v16 }
 0x317   :  { %2353 = vmatpush3.bf16.msra.mxu0 %v2640_v15  ;;  %2368 = vmatprep.mubr.msk.bf16.mxu0 %vm2740_vm2, %v2739_v13 }
 0x318   :  { %2354 = vmatprep.subr.bf16.mxu0 %v2739_v13 }
 0x31b   :  { %2355 = vmatpush3.bf16.msra.mxu0 %v2641_v17 }
 0x31c   :  { %2356 = vmatprep.subr.bf16.mxu0 %v2739_v13 }
 0x31f   :  { %2357 = vmatpush3.bf16.msra.mxu0 %v2642_v18 }
 0x320   :  { %2358 = vmatprep.subr.bf16.mxu0 %v2739_v13 }
 0x323   :  { %2359 = vmatpush3.bf16.msra.mxu0 %v2643_v0 }
 0x324   :  { %2360 = vmatprep.subr.bf16.mxu0 %v2739_v13 }
 0x327   :  { %2361 = vmatpush3.bf16.msra.mxu0 %v2644_v19 }
 0x328   :  { %2362 = vmatprep.subr.bf16.mxu0 %v2739_v13 }
 0x32b   :  { %2363 = vmatpush3.bf16.msra.mxu0 %v2645_v20 }
 0x32c   :  { %2364 = vmatprep.subr.bf16.mxu0 %v2739_v13 }
 0x32f   :  { %2365 = vmatpush3.bf16.msra.mxu0 %v2646_v21 }
 0x330   :  { %2366 = vmatprep.subr.bf16.mxu0 %v2739_v13 }
 0x333   :  { %2367 = vmatpush3.bf16.msra.mxu0 %v2647_v22 }
 0x336   :  { %2369 = vmatmul.mubr.bf16.vlgmr.msra.gmra.mrb[20].mxu0 %v1825_v23 }
 0x3c9   :  { %v1596_v32 = vpop.f32.mrb[12].mxu0  ;;  %v1798_v33 = vpop.f32.mrb[4].mxu1 }
 0x3ca   :  { %v2310_v34 = vpop.f32.mrb[13].mxu0  ;;  %v2350_v35 = vpop.f32.mrb[5].mxu1 }
 0x3cb   :  { %v1599_v36 = vpop.f32.mrb[14].mxu0  ;;  %v1801_v37 = vpop.f32.mrb[6].mxu1 }
 0x3cc   :  { %v2311_v38 = vpop.f32.mrb[15].mxu0  ;;  %v2351_v39 = vpop.f32.mrb[7].mxu1 }
 0x3e9   :  { %v1688_v40 = vpop.f32.mrb[16].mxu0 }
 0x3ea   :  { %v1689_v41 = vadd.f32 %v1688_v40, %v1596_v32  ;;  %v2330_v42 = vpop.f32.mrb[17].mxu0 }
 0x3eb   :  { %v1691_v43 = vpop.f32.mrb[18].mxu0 }
 0x3ec   :  { %v2331_v44 = vpop.f32.mrb[19].mxu0  ;;  %v1804_v45 = vadd.f32 %v1798_v33, %v1689_v41 }
 0x409   :  { %v1909_v13 = vpop.f32.mrb[20].mxu0 }
 0x40a   :  { %v1915_v47 = vadd.f32 %v1909_v13, %v1804_v45  ;;  %v2370_v48 = vpop.f32.mrb[21].mxu0 }
 0x40b   :  { %v1912_v49 = vpop.f32.mrb[22].mxu0 }
 0x40c   :  { %v1923_v50 = vadd.f32 %v2237_v46, %v1915_v47  ;;  %v2371_v51 = vpop.f32.mrb[23].mxu0 }
 0x40e   :  { %v1924_v52 = vmax.f32 %v1923_v50, 0.0 }
 0x410   :  { %v1925_v53 = vpack.c.bf16 %v1924_v52, %v1924_v52 }
 0x412   :  { %2389 = vmatmul.mubr.bf16.vlgmr.msra.gmra.mrb[8].mxu1 %v1925_v53 }
 0x4e5   :  { %v2031_v55 = vpop.f32.mrb[8].mxu1 }
 0x4e6   :  { %v2032_v56 = vadd.f32 %v2238_v54, %v2031_v55  ;;  %v2390_v57 = vpop.f32.mrb[9].mxu1 }
 0x4e7   :  { %v2034_v58 = vpop.f32.mrb[10].mxu1 }
 0x4e8   :  { %v2391_v59 = vpop.f32.mrb[11].mxu1  ;;  %v2038_v60 = vsel %vm2037_vm4, %v2032_v56, -inf }
 0x4e9   :  { %2039 = vmax.xlane.f32.xlu0 %v2038_v60 }
 0x576   :  { %v2040_v61 = vpop.xlane.xlu0 %2039 }
 0x577   :  { %v2041_v62 = vsub.f32 %v2032_v56, %v2040_v61 }
 0x579   :  { %v2042_v63 = vmul.f32 1.442695, %v2041_v62 }
 0x57b   :  { %2656 = vpow2.f32 %v2042_v63 }
 0x585   :  { %v2657_v1 = vpop.eup %2656 }
 0x586   :  { %v2044_v2 = vsel %vm2037_vm4, %v2657_v1, 0.0 }
 0x587   :  { %2045 = vadd.xlane.f32.xlu0 %v2044_v2 }
 0x614   :  { %v2046_v3 = vpop.xlane.xlu0 %2045 }
 0x615   :  { %2658 = vlog2.f32 %v2046_v3 }
 0x61f   :  { %v2659_v4 = vpop.eup %2658 }
 0x620   :  { %v2048_v5 = vmul.f32 0.6931472, %v2659_v4 }
 0x622   :  { %v2049_v6 = vsub.f32 %v2041_v62, %v2048_v5 }
 0x624   :  { %2050 = vst [vmem:[#allocation8] sm:$0x3] %v2049_v6 }
 0x625   :  { %2715 = shalt.err (!%p2712_p6)
}
 0x626   :  { %s2716_s20 = scalar_lea.hbm %s3118_s9, 32 }
 0x627   :  { %p2717_p7 = scmp.ne.s32.totalorder %s3118_s9, %s2716_s20  ;;  %p2720_p8 = scmp.lt.u32.totalorder %s2716_s20, %s3118_s9 }
 0x629   :  { %p2722_p9 = pnand %p2720_p8, %p2717_p7 }
 0x62b   :  { %2725 = shalt.err (!%p2722_p9)
}
 0x62c   :  { %2060 = dma.vmem_to_hbm [thread:$0]  %s2058_s8, 32, %s3118_s9, [#allocation5]  }
 0x62d   :  { %2730 = dma.done.wait [#allocation5], 32  }
 0x62e   :  { %2731 = vsyncadd [#allocation5], 4294967264 }
 0x62f   :  { %2064 = vsyncpa [#allocation4], 1 }
 0x630   :  { %2065 = vsyncpa [#allocation7], 1 }
 0x631   :  { %2066 = vsyncpa [#allocation5], 1 }

</bundles_post_ra>
